<compile_context>
chip_gen: v6e
topology: v6e:2x2x1
jax: 0.10.0
libtpu: 0.0.40
codegen_flags: <defaults>
</compile_context>

<pallas_src>
import jax
import jax.numpy as jnp
from jax.experimental import pallas as pl
from jax.experimental.pallas import tpu as pltpu

# ---- small synthetic config (mirrors BART encoder hyper-parameter structure) ----
VOCAB = 64
HIDDEN = 32
N_HEADS = 4
HEAD_DIM = HIDDEN // N_HEADS
FFN = 64
N_LAYERS = 2
MAX_POS = 64          # learned positional embeddings, BART offset of 2
PAD_ID = 1
LN_EPS = 1e-5


# ---------------- fused Pallas kernel ----------------
def _fused_model_kernel(gather_ref,                         # SMEM scalar prefetch: [B, N] int32
                        h_ref, bias_ref, maskcls_ref,       # per-batch blocks
                        ln_e_g_ref, ln_e_b_ref,             # embedding LN
                        wqkv_ref, bqkv_ref, wo_ref, bo_ref,  # attention weights (stacked over L)
                        ln1_g_ref, ln1_b_ref,
                        w1_ref, b1_ref, w2_ref, b2_ref,      # FFN weights (stacked over L)
                        ln2_g_ref, ln2_b_ref,
                        cls_w_ref, cls_b_ref,                # classifier
                        out_ref,                             # [1, N, 1] sentence scores
                        work_ref, sent_ref):                 # VMEM scratch: [S,H], [N,H]
    b_idx = pl.program_id(0)
    S = h_ref.shape[1]
    H = h_ref.shape[2]
    n_cls = sent_ref.shape[0]
    scale = HEAD_DIM ** -0.5

    def layer_norm(x, g, b):
        mu = jnp.mean(x, axis=-1, keepdims=True)
        xc = x - mu
        var = jnp.mean(xc * xc, axis=-1, keepdims=True)
        return xc * jax.lax.rsqrt(var + LN_EPS) * g + b

    # embedding LayerNorm (no zero-residual add)
    h = layer_norm(h_ref[0], ln_e_g_ref[...], ln_e_b_ref[...])      # [S, H]
    bias = bias_ref[0]                                              # [1, S] additive key-pad bias

    for l in range(N_LAYERS):
        # ---- self-attention: fused QKV matmul, heads split in-VMEM ----
        residual = h
        qkv = jnp.dot(h, wqkv_ref[l], preferred_element_type=jnp.float32) + bqkv_ref[l]  # [S, 3H]
        for hh in range(N_HEADS):
            lo = hh * HEAD_DIM
            q_h = qkv[:, lo:lo + HEAD_DIM]                           # [S, DH]
            k_h = qkv[:, H + lo:H + lo + HEAD_DIM]
            v_h = qkv[:, 2 * H + lo:2 * H + lo + HEAD_DIM]
            s = jnp.einsum('qd,kd->qk', q_h, k_h,
                           preferred_element_type=jnp.float32) * scale   # [S, S]
            s = s + bias
            s = s - jnp.max(s, axis=-1, keepdims=True)
            e = jnp.exp(s)
            probs = e * pl.reciprocal(jnp.sum(e, axis=-1, keepdims=True), approx=True)
            c = jnp.dot(probs, v_h, preferred_element_type=jnp.float32)  # [S, DH]
            work_ref[:, pl.ds(lo, HEAD_DIM)] = c
        ctx = work_ref[...]                                          # [S, H] (all heads)
        attn_out = jnp.dot(ctx, wo_ref[l], preferred_element_type=jnp.float32) + bo_ref[l]
        h = layer_norm(attn_out + residual, ln1_g_ref[l], ln1_b_ref[l])

        # ---- feed-forward ----
        residual = h
        f = jnp.dot(h, w1_ref[l], preferred_element_type=jnp.float32) + b1_ref[l]
        # TODO(synk): BART uses exact (erf) GELU; tanh approximation used for Mosaic-safe lowering.
        f = jax.nn.gelu(f, approximate=True)
        f = jnp.dot(f, w2_ref[l], preferred_element_type=jnp.float32) + b2_ref[l]
        h = layer_norm(f + residual, ln2_g_ref[l], ln2_b_ref[l])

    # ---- CLS-row gather (fused) + classifier: sigmoid(Linear(x * mask)) * mask ----
    work_ref[...] = h                                                # bert_out rows for this batch
    for j in range(n_cls):
        row = gather_ref[b_idx, j]                                   # dynamic SMEM index
        sent_ref[pl.ds(j, 1), :] = work_ref[pl.ds(row, 1), :]
    mask = maskcls_ref[0]                                            # [N, 1]
    sent = sent_ref[...] * mask
    logit = jnp.sum(sent * cls_w_ref[...], axis=-1, keepdims=True) + cls_b_ref[...]   # [N, 1]
    out_ref[0] = jax.nn.sigmoid(logit) * mask


def _fused_forward(gather_ids, h_emb, attn_bias, mask_f, p):
    B, S, H = h_emb.shape
    N = gather_ids.shape[1]
    L = p['wqkv'].shape[0]
    F = p['w1'].shape[2]

    def full(shape):
        return pl.BlockSpec(shape, lambda b, g, _s=shape: (0,) * len(_s))

    in_specs = [
        pl.BlockSpec((1, S, H), lambda b, g: (b, 0, 0)),   # embedded tokens
        pl.BlockSpec((1, 1, S), lambda b, g: (b, 0, 0)),   # additive key-pad bias
        pl.BlockSpec((1, N, 1), lambda b, g: (b, 0, 0)),   # mask_cls (float)
        full((1, H)), full((1, H)),                        # embedding LN
        full((L, H, 3 * H)), full((L, 1, 3 * H)),          # fused QKV
        full((L, H, H)), full((L, 1, H)),                  # attn out proj
        full((L, 1, H)), full((L, 1, H)),                  # LN1
        full((L, H, F)), full((L, 1, F)),                  # FFN up
        full((L, F, H)), full((L, 1, H)),                  # FFN down
        full((L, 1, H)), full((L, 1, H)),                  # LN2
        full((1, H)), full((1, 1)),                        # classifier
    ]

    return pl.pallas_call(
        _fused_model_kernel,
        out_shape=jax.ShapeDtypeStruct((B, N, 1), jnp.float32),
        grid_spec=pltpu.PrefetchScalarGridSpec(
            num_scalar_prefetch=1,
            grid=(B,),
            in_specs=in_specs,
            out_specs=pl.BlockSpec((1, N, 1), lambda b, g: (b, 0, 0)),
            scratch_shapes=[pltpu.VMEM((S, H), jnp.float32),
                            pltpu.VMEM((N, H), jnp.float32)]),
        compiler_params=pltpu.CompilerParams(dimension_semantics=("parallel",)),
    )(gather_ids, h_emb, attn_bias, mask_f,
      p['ln_emb_g'], p['ln_emb_b'],
      p['wqkv'], p['bqkv'], p['wo'], p['bo'],
      p['ln1_g'], p['ln1_b'],
      p['w1'], p['b1'], p['w2'], p['b2'],
      p['ln2_g'], p['ln2_b'],
      p['cls_w'], p['cls_b'])


# ---------------- parameter init (deterministic, synthetic, pre-stacked/fused) ----------------
def _dense(key, fan_in, fan_out):
    kw, kb = jax.random.split(key)
    w = jax.random.normal(kw, (fan_in, fan_out), jnp.float32) * 0.02
    b = jax.random.normal(kb, (fan_out,), jnp.float32) * 0.02
    return w, b


def init_params(key):
    keys = jax.random.split(key, 3 + N_LAYERS)
    params = {
        'tok_emb': jax.random.normal(keys[0], (VOCAB, HIDDEN), jnp.float32) * 0.02,
        'pos_emb': jax.random.normal(keys[1], (MAX_POS + 2, HIDDEN), jnp.float32) * 0.02,
        'ln_emb_g': jnp.ones((1, HIDDEN), jnp.float32),
        'ln_emb_b': jnp.zeros((1, HIDDEN), jnp.float32),
    }
    cls_w, cls_b = _dense(keys[2], HIDDEN, 1)          # nn.Linear(hidden_size, 1)
    params['cls_w'] = cls_w.reshape(1, HIDDEN)
    params['cls_b'] = cls_b.reshape(1, 1)

    wqkv, bqkv, wo, bo = [], [], [], []
    w1s, b1s, w2s, b2s = [], [], [], []
    for l in range(N_LAYERS):
        lk = jax.random.split(keys[3 + l], 6)
        wq, bq = _dense(lk[0], HIDDEN, HIDDEN)
        wk, bk = _dense(lk[1], HIDDEN, HIDDEN)
        wv, bv = _dense(lk[2], HIDDEN, HIDDEN)
        wo_l, bo_l = _dense(lk[3], HIDDEN, HIDDEN)
        w1, b1 = _dense(lk[4], HIDDEN, FFN)
        w2, b2 = _dense(lk[5], FFN, HIDDEN)
        wqkv.append(jnp.concatenate([wq, wk, wv], axis=1))            # [H, 3H]
        bqkv.append(jnp.concatenate([bq, bk, bv]).reshape(1, 3 * HIDDEN))
        wo.append(wo_l)
        bo.append(bo_l.reshape(1, HIDDEN))
        w1s.append(w1)
        b1s.append(b1.reshape(1, FFN))
        w2s.append(w2)
        b2s.append(b2.reshape(1, HIDDEN))

    params.update(
        wqkv=jnp.stack(wqkv), bqkv=jnp.stack(bqkv),
        wo=jnp.stack(wo), bo=jnp.stack(bo),
        ln1_g=jnp.ones((N_LAYERS, 1, HIDDEN), jnp.float32),
        ln1_b=jnp.zeros((N_LAYERS, 1, HIDDEN), jnp.float32),
        w1=jnp.stack(w1s), b1=jnp.stack(b1s),
        w2=jnp.stack(w2s), b2=jnp.stack(b2s),
        ln2_g=jnp.ones((N_LAYERS, 1, HIDDEN), jnp.float32),
        ln2_b=jnp.zeros((N_LAYERS, 1, HIDDEN), jnp.float32),
    )
    return params


# ---------------- forward pass (training-mode semantics of BaselineExtModel.forward) ----------------
def baseline_ext_forward(params, text_id, cls_ids):
    B, S = text_id.shape
    N = cls_ids.shape[1]
    doc_inp_mask = (text_id != PAD_ID).astype(jnp.float32)        # ~(text_id == pad_id)
    mask_cls = 1 - (cls_ids == -1).astype(jnp.int32)              # 1 - (cls_ids == -1).long()

    # token + learned positional embedding (BART offset of 2); vocab gather stays in XLA.
    h = (params['tok_emb'][text_id] + params['pos_emb'][2:2 + S][None]).astype(jnp.float32)

    attn_bias = ((1.0 - doc_inp_mask) * -1e9).reshape(B, 1, S)    # additive key-padding bias (once per batch)
    mask_f = mask_cls.astype(jnp.float32).reshape(B, N, 1)
    gather_ids = jnp.where(cls_ids < 0, cls_ids + S, cls_ids).astype(jnp.int32)  # torch -1 == last row

    scores = _fused_forward(gather_ids, h, attn_bias, mask_f, params)   # [B, N, 1]
    return {'pred': scores.reshape(B, N), 'mask': mask_cls}
    # TODO(synk): eval-mode get_output() / fast_rouge() need python text dicts + ROUGE; no Pallas equivalent.


if __name__ == "__main__":
    key = jax.random.PRNGKey(0)
    pkey, dkey = jax.random.split(key)
    params = init_params(pkey)

    B, S, N_CLS = 2, 16, 4
    text_id = jax.random.randint(dkey, (B, S), 2, VOCAB).astype(jnp.int32)
    text_id = text_id.at[1, 12:].set(PAD_ID)            # pad tail of second example
    cls_ids = jnp.array([[0, 5, 10, -1],
                         [0, 4, 8, -1]], dtype=jnp.int32)

    fwd = jax.jit(baseline_ext_forward)
    out = fwd(params, text_id, cls_ids)
    jax.block_until_ready(out)

    assert out['pred'].shape == (B, N_CLS)
    assert out['mask'].shape == (B, N_CLS)
    assert bool(jnp.all(jnp.isfinite(out['pred'])))
    print("KERNEL_OK")
</pallas_src>

<mosaic_0001>
module attributes {stable_mosaic.version = 11 : i64} {
  func.func @_fused_model_kernel(%arg0: i32, %arg1: memref<2x4xi32, #tpu.memory_space<smem>>, %arg2: memref<1x16x32xf32, #tpu.memory_space<vmem>>, %arg3: memref<1x1x16xf32, #tpu.memory_space<vmem>>, %arg4: memref<1x4x1xf32, #tpu.memory_space<vmem>>, %arg5: memref<1x32xf32, #tpu.memory_space<vmem>>, %arg6: memref<1x32xf32, #tpu.memory_space<vmem>>, %arg7: memref<2x32x96xf32, #tpu.memory_space<vmem>>, %arg8: memref<2x1x96xf32, #tpu.memory_space<vmem>>, %arg9: memref<2x32x32xf32, #tpu.memory_space<vmem>>, %arg10: memref<2x1x32xf32, #tpu.memory_space<vmem>>, %arg11: memref<2x1x32xf32, #tpu.memory_space<vmem>>, %arg12: memref<2x1x32xf32, #tpu.memory_space<vmem>>, %arg13: memref<2x32x64xf32, #tpu.memory_space<vmem>>, %arg14: memref<2x1x64xf32, #tpu.memory_space<vmem>>, %arg15: memref<2x64x32xf32, #tpu.memory_space<vmem>>, %arg16: memref<2x1x32xf32, #tpu.memory_space<vmem>>, %arg17: memref<2x1x32xf32, #tpu.memory_space<vmem>>, %arg18: memref<2x1x32xf32, #tpu.memory_space<vmem>>, %arg19: memref<1x32xf32, #tpu.memory_space<vmem>>, %arg20: memref<1x1xf32, #tpu.memory_space<vmem>>, %arg21: memref<1x4x1xf32, #tpu.memory_space<vmem>>, %arg22: memref<16x32xf32, #tpu.memory_space<vmem>>, %arg23: memref<4x32xf32, #tpu.memory_space<vmem>>) attributes {dimension_semantics = [#tpu.dimension_semantics<parallel>], iteration_bounds = array<i64: 2>, scalar_prefetch = 1 : i64, scratch_operands = 2 : i64, tpu.core_type = #tpu.core_type<tc>, window_params = [{transform_indices = @transform_0, window_bounds = array<i64: 1, 16, 32>}, {transform_indices = @transform_1, window_bounds = array<i64: 1, 1, 16>}, {transform_indices = @transform_2, window_bounds = array<i64: 1, 4, 1>}, {pipeline_mode = #tpu.pipeline_mode<synchronous>, transform_indices = @transform_3, window_bounds = array<i64: 1, 32>}, {pipeline_mode = #tpu.pipeline_mode<synchronous>, transform_indices = @transform_4, window_bounds = array<i64: 1, 32>}, {pipeline_mode = #tpu.pipeline_mode<synchronous>, transform_indices = @transform_5, window_bounds = array<i64: 2, 32, 96>}, {pipeline_mode = #tpu.pipeline_mode<synchronous>, transform_indices = @transform_6, window_bounds = array<i64: 2, 1, 96>}, {pipeline_mode = #tpu.pipeline_mode<synchronous>, transform_indices = @transform_7, window_bounds = array<i64: 2, 32, 32>}, {pipeline_mode = #tpu.pipeline_mode<synchronous>, transform_indices = @transform_8, window_bounds = array<i64: 2, 1, 32>}, {pipeline_mode = #tpu.pipeline_mode<synchronous>, transform_indices = @transform_9, window_bounds = array<i64: 2, 1, 32>}, {pipeline_mode = #tpu.pipeline_mode<synchronous>, transform_indices = @transform_10, window_bounds = array<i64: 2, 1, 32>}, {pipeline_mode = #tpu.pipeline_mode<synchronous>, transform_indices = @transform_11, window_bounds = array<i64: 2, 32, 64>}, {pipeline_mode = #tpu.pipeline_mode<synchronous>, transform_indices = @transform_12, window_bounds = array<i64: 2, 1, 64>}, {pipeline_mode = #tpu.pipeline_mode<synchronous>, transform_indices = @transform_13, window_bounds = array<i64: 2, 64, 32>}, {pipeline_mode = #tpu.pipeline_mode<synchronous>, transform_indices = @transform_14, window_bounds = array<i64: 2, 1, 32>}, {pipeline_mode = #tpu.pipeline_mode<synchronous>, transform_indices = @transform_15, window_bounds = array<i64: 2, 1, 32>}, {pipeline_mode = #tpu.pipeline_mode<synchronous>, transform_indices = @transform_16, window_bounds = array<i64: 2, 1, 32>}, {pipeline_mode = #tpu.pipeline_mode<synchronous>, transform_indices = @transform_17, window_bounds = array<i64: 1, 32>}, {pipeline_mode = #tpu.pipeline_mode<synchronous>, transform_indices = @transform_18, window_bounds = array<i64: 1, 1>}, {transform_indices = @transform_19, window_bounds = array<i64: 1, 4, 1>}]} {
    %c0 = arith.constant 0 : index
    %c0_0 = arith.constant 0 : index
    %c0_1 = arith.constant 0 : index
    %0 = vector.load %arg2[%c0, %c0_0, %c0_1] : memref<1x16x32xf32, #tpu.memory_space<vmem>>, vector<1x16x32xf32>
    %1 = vector.shape_cast %0 : vector<1x16x32xf32> to vector<16x32xf32>
    %c0_2 = arith.constant 0 : index
    %c0_3 = arith.constant 0 : index
    %2 = vector.load %arg5[%c0_2, %c0_3] : memref<1x32xf32, #tpu.memory_space<vmem>>, vector<1x32xf32>
    %c0_4 = arith.constant 0 : index
    %c0_5 = arith.constant 0 : index
    %3 = vector.load %arg6[%c0_4, %c0_5] : memref<1x32xf32, #tpu.memory_space<vmem>>, vector<1x32xf32>
    %cst = arith.constant dense<0.000000e+00> : vector<16xf32>
    %4 = vector.multi_reduction <add>, %1, %cst [1] : vector<16x32xf32> to vector<16xf32>
    %5 = vector.shape_cast %4 : vector<16xf32> to vector<16x1xf32>
    %cst_6 = arith.constant 3.200000e+01 : f32
    %6 = vector.broadcast %cst_6 : f32 to vector<16x1xf32>
    %7 = arith.divf %5, %6 : vector<16x1xf32>
    %8 = vector.broadcast %7 : vector<16x1xf32> to vector<16x32xf32>
    %9 = arith.subf %1, %8 : vector<16x32xf32>
    %10 = arith.mulf %9, %9 : vector<16x32xf32>
    %cst_7 = arith.constant dense<0.000000e+00> : vector<16xf32>
    %11 = vector.multi_reduction <add>, %10, %cst_7 [1] : vector<16x32xf32> to vector<16xf32>
    %12 = vector.shape_cast %11 : vector<16xf32> to vector<16x1xf32>
    %cst_8 = arith.constant 3.200000e+01 : f32
    %13 = vector.broadcast %cst_8 : f32 to vector<16x1xf32>
    %14 = arith.divf %12, %13 : vector<16x1xf32>
    %cst_9 = arith.constant 9.99999974E-6 : f32
    %15 = vector.broadcast %cst_9 : f32 to vector<16x1xf32>
    %16 = arith.addf %14, %15 : vector<16x1xf32>
    %17 = math.rsqrt %16 : vector<16x1xf32>
    %18 = vector.broadcast %17 : vector<16x1xf32> to vector<16x32xf32>
    %19 = arith.mulf %9, %18 : vector<16x32xf32>
    %20 = vector.broadcast %2 : vector<1x32xf32> to vector<16x32xf32>
    %21 = arith.mulf %19, %20 : vector<16x32xf32>
    %22 = vector.broadcast %3 : vector<1x32xf32> to vector<16x32xf32>
    %23 = arith.addf %21, %22 : vector<16x32xf32>
    %c0_10 = arith.constant 0 : index
    %c0_11 = arith.constant 0 : index
    %c0_12 = arith.constant 0 : index
    %24 = vector.load %arg3[%c0_10, %c0_11, %c0_12] : memref<1x1x16xf32, #tpu.memory_space<vmem>>, vector<1x1x16xf32>
    %25 = vector.shape_cast %24 : vector<1x1x16xf32> to vector<1x16xf32>
    %c0_13 = arith.constant 0 : index
    %c0_14 = arith.constant 0 : index
    %c0_15 = arith.constant 0 : index
    %26 = vector.load %arg7[%c0_13, %c0_14, %c0_15] : memref<2x32x96xf32, #tpu.memory_space<vmem>>, vector<1x32x96xf32>
    %27 = vector.shape_cast %26 : vector<1x32x96xf32> to vector<32x96xf32>
    %cst_16 = arith.constant dense<0.000000e+00> : vector<16x96xf32>
    %28 = tpu.matmul %23, %27, %cst_16 {dimension_numbers = #tpu.dot_dimension_numbers<[1], [0], [0], [1], [0, 0, 1, 1], [], []>} : vector<16x32xf32>, vector<32x96xf32>, vector<16x96xf32> -> vector<16x96xf32>
    %c0_17 = arith.constant 0 : index
    %c0_18 = arith.constant 0 : index
    %c0_19 = arith.constant 0 : index
    %29 = vector.load %arg8[%c0_17, %c0_18, %c0_19] : memref<2x1x96xf32, #tpu.memory_space<vmem>>, vector<1x1x96xf32>
    %30 = vector.shape_cast %29 : vector<1x1x96xf32> to vector<1x96xf32>
    %31 = vector.broadcast %30 : vector<1x96xf32> to vector<16x96xf32>
    %32 = arith.addf %28, %31 : vector<16x96xf32>
    %33 = vector.extract_strided_slice %32 {offsets = [0, 0], sizes = [16, 8], strides = [1, 1]} : vector<16x96xf32> to vector<16x8xf32>
    %34 = vector.extract_strided_slice %32 {offsets = [0, 32], sizes = [16, 8], strides = [1, 1]} : vector<16x96xf32> to vector<16x8xf32>
    %35 = vector.extract_strided_slice %32 {offsets = [0, 64], sizes = [16, 8], strides = [1, 1]} : vector<16x96xf32> to vector<16x8xf32>
    "tpu.trace_start"() <{level = 10 : i32, message = "qd,kd->qk"}> : () -> ()
    %cst_20 = arith.constant dense<0.000000e+00> : vector<16x16xf32>
    %36 = tpu.matmul %33, %34, %cst_20 {dimension_numbers = #tpu.dot_dimension_numbers<[1], [1], [0], [0], [0, 0, 1, 0], [], []>} : vector<16x8xf32>, vector<16x8xf32>, vector<16x16xf32> -> vector<16x16xf32>
    "tpu.trace_stop"() : () -> ()
    %cst_21 = arith.constant 0.353553385 : f32
    %37 = vector.broadcast %cst_21 : f32 to vector<16x16xf32>
    %38 = arith.mulf %36, %37 : vector<16x16xf32>
    %39 = vector.broadcast %25 : vector<1x16xf32> to vector<16x16xf32>
    %40 = arith.addf %38, %39 : vector<16x16xf32>
    %cst_22 = arith.constant dense<0xFF800000> : vector<16xf32>
    %41 = vector.multi_reduction <maximumf>, %40, %cst_22 [1] : vector<16x16xf32> to vector<16xf32>
    %42 = vector.shape_cast %41 : vector<16xf32> to vector<16x1xf32>
    %43 = vector.broadcast %42 : vector<16x1xf32> to vector<16x16xf32>
    %44 = arith.subf %40, %43 : vector<16x16xf32>
    %45 = math.exp %44 : vector<16x16xf32>
    %cst_23 = arith.constant dense<0.000000e+00> : vector<16xf32>
    %46 = vector.multi_reduction <add>, %45, %cst_23 [1] : vector<16x16xf32> to vector<16xf32>
    %47 = vector.shape_cast %46 : vector<16xf32> to vector<16x1xf32>
    %48 = tpu.reciprocal %47 {approx = true} : vector<16x1xf32> -> vector<16x1xf32>
    %49 = vector.broadcast %48 : vector<16x1xf32> to vector<16x16xf32>
    %50 = arith.mulf %45, %49 : vector<16x16xf32>
    %cst_24 = arith.constant dense<0.000000e+00> : vector<16x8xf32>
    %51 = tpu.matmul %50, %35, %cst_24 {dimension_numbers = #tpu.dot_dimension_numbers<[1], [0], [0], [1], [0, 0, 1, 1], [], []>} : vector<16x16xf32>, vector<16x8xf32>, vector<16x8xf32> -> vector<16x8xf32>
    %c0_25 = arith.constant 0 : index
    %c0_26 = arith.constant 0 : index
    %52 = vector.load %arg22[%c0_25, %c0_26] : memref<16x32xf32, #tpu.memory_space<vmem>>, vector<16x8xf32>
    tpu.vector_store %arg22[%c0_25, %c0_26], %51 {strides = array<i32>} : memref<16x32xf32, #tpu.memory_space<vmem>>, vector<16x8xf32>,
    %53 = vector.extract_strided_slice %32 {offsets = [0, 8], sizes = [16, 8], strides = [1, 1]} : vector<16x96xf32> to vector<16x8xf32>
    %54 = vector.extract_strided_slice %32 {offsets = [0, 40], sizes = [16, 8], strides = [1, 1]} : vector<16x96xf32> to vector<16x8xf32>
    %55 = vector.extract_strided_slice %32 {offsets = [0, 72], sizes = [16, 8], strides = [1, 1]} : vector<16x96xf32> to vector<16x8xf32>
    "tpu.trace_start"() <{level = 10 : i32, message = "qd,kd->qk"}> : () -> ()
    %cst_27 = arith.constant dense<0.000000e+00> : vector<16x16xf32>
    %56 = tpu.matmul %53, %54, %cst_27 {dimension_numbers = #tpu.dot_dimension_numbers<[1], [1], [0], [0], [0, 0, 1, 0], [], []>} : vector<16x8xf32>, vector<16x8xf32>, vector<16x16xf32> -> vector<16x16xf32>
    "tpu.trace_stop"() : () -> ()
    %cst_28 = arith.constant 0.353553385 : f32
    %57 = vector.broadcast %cst_28 : f32 to vector<16x16xf32>
    %58 = arith.mulf %56, %57 : vector<16x16xf32>
    %59 = vector.broadcast %25 : vector<1x16xf32> to vector<16x16xf32>
    %60 = arith.addf %58, %59 : vector<16x16xf32>
    %cst_29 = arith.constant dense<0xFF800000> : vector<16xf32>
    %61 = vector.multi_reduction <maximumf>, %60, %cst_29 [1] : vector<16x16xf32> to vector<16xf32>
    %62 = vector.shape_cast %61 : vector<16xf32> to vector<16x1xf32>
    %63 = vector.broadcast %62 : vector<16x1xf32> to vector<16x16xf32>
    %64 = arith.subf %60, %63 : vector<16x16xf32>
    %65 = math.exp %64 : vector<16x16xf32>
    %cst_30 = arith.constant dense<0.000000e+00> : vector<16xf32>
    %66 = vector.multi_reduction <add>, %65, %cst_30 [1] : vector<16x16xf32> to vector<16xf32>
    %67 = vector.shape_cast %66 : vector<16xf32> to vector<16x1xf32>
    %68 = tpu.reciprocal %67 {approx = true} : vector<16x1xf32> -> vector<16x1xf32>
    %69 = vector.broadcast %68 : vector<16x1xf32> to vector<16x16xf32>
    %70 = arith.mulf %65, %69 : vector<16x16xf32>
    %cst_31 = arith.constant dense<0.000000e+00> : vector<16x8xf32>
    %71 = tpu.matmul %70, %55, %cst_31 {dimension_numbers = #tpu.dot_dimension_numbers<[1], [0], [0], [1], [0, 0, 1, 1], [], []>} : vector<16x16xf32>, vector<16x8xf32>, vector<16x8xf32> -> vector<16x8xf32>
    %c0_32 = arith.constant 0 : index
    %c8 = arith.constant 8 : index
    %72 = vector.load %arg22[%c0_32, %c8] : memref<16x32xf32, #tpu.memory_space<vmem>>, vector<16x8xf32>
    tpu.vector_store %arg22[%c0_32, %c8], %71 {strides = array<i32>} : memref<16x32xf32, #tpu.memory_space<vmem>>, vector<16x8xf32>,
    %73 = vector.extract_strided_slice %32 {offsets = [0, 16], sizes = [16, 8], strides = [1, 1]} : vector<16x96xf32> to vector<16x8xf32>
    %74 = vector.extract_strided_slice %32 {offsets = [0, 48], sizes = [16, 8], strides = [1, 1]} : vector<16x96xf32> to vector<16x8xf32>
    %75 = vector.extract_strided_slice %32 {offsets = [0, 80], sizes = [16, 8], strides = [1, 1]} : vector<16x96xf32> to vector<16x8xf32>
    "tpu.trace_start"() <{level = 10 : i32, message = "qd,kd->qk"}> : () -> ()
    %cst_33 = arith.constant dense<0.000000e+00> : vector<16x16xf32>
    %76 = tpu.matmul %73, %74, %cst_33 {dimension_numbers = #tpu.dot_dimension_numbers<[1], [1], [0], [0], [0, 0, 1, 0], [], []>} : vector<16x8xf32>, vector<16x8xf32>, vector<16x16xf32> -> vector<16x16xf32>
    "tpu.trace_stop"() : () -> ()
    %cst_34 = arith.constant 0.353553385 : f32
    %77 = vector.broadcast %cst_34 : f32 to vector<16x16xf32>
    %78 = arith.mulf %76, %77 : vector<16x16xf32>
    %79 = vector.broadcast %25 : vector<1x16xf32> to vector<16x16xf32>
    %80 = arith.addf %78, %79 : vector<16x16xf32>
    %cst_35 = arith.constant dense<0xFF800000> : vector<16xf32>
    %81 = vector.multi_reduction <maximumf>, %80, %cst_35 [1] : vector<16x16xf32> to vector<16xf32>
    %82 = vector.shape_cast %81 : vector<16xf32> to vector<16x1xf32>
    %83 = vector.broadcast %82 : vector<16x1xf32> to vector<16x16xf32>
    %84 = arith.subf %80, %83 : vector<16x16xf32>
    %85 = math.exp %84 : vector<16x16xf32>
    %cst_36 = arith.constant dense<0.000000e+00> : vector<16xf32>
    %86 = vector.multi_reduction <add>, %85, %cst_36 [1] : vector<16x16xf32> to vector<16xf32>
    %87 = vector.shape_cast %86 : vector<16xf32> to vector<16x1xf32>
    %88 = tpu.reciprocal %87 {approx = true} : vector<16x1xf32> -> vector<16x1xf32>
    %89 = vector.broadcast %88 : vector<16x1xf32> to vector<16x16xf32>
    %90 = arith.mulf %85, %89 : vector<16x16xf32>
    %cst_37 = arith.constant dense<0.000000e+00> : vector<16x8xf32>
    %91 = tpu.matmul %90, %75, %cst_37 {dimension_numbers = #tpu.dot_dimension_numbers<[1], [0], [0], [1], [0, 0, 1, 1], [], []>} : vector<16x16xf32>, vector<16x8xf32>, vector<16x8xf32> -> vector<16x8xf32>
    %c0_38 = arith.constant 0 : index
    %c16 = arith.constant 16 : index
    %92 = vector.load %arg22[%c0_38, %c16] : memref<16x32xf32, #tpu.memory_space<vmem>>, vector<16x8xf32>
    tpu.vector_store %arg22[%c0_38, %c16], %91 {strides = array<i32>} : memref<16x32xf32, #tpu.memory_space<vmem>>, vector<16x8xf32>,
    %93 = vector.extract_strided_slice %32 {offsets = [0, 24], sizes = [16, 8], strides = [1, 1]} : vector<16x96xf32> to vector<16x8xf32>
    %94 = vector.extract_strided_slice %32 {offsets = [0, 56], sizes = [16, 8], strides = [1, 1]} : vector<16x96xf32> to vector<16x8xf32>
    %95 = vector.extract_strided_slice %32 {offsets = [0, 88], sizes = [16, 8], strides = [1, 1]} : vector<16x96xf32> to vector<16x8xf32>
    "tpu.trace_start"() <{level = 10 : i32, message = "qd,kd->qk"}> : () -> ()
    %cst_39 = arith.constant dense<0.000000e+00> : vector<16x16xf32>
    %96 = tpu.matmul %93, %94, %cst_39 {dimension_numbers = #tpu.dot_dimension_numbers<[1], [1], [0], [0], [0, 0, 1, 0], [], []>} : vector<16x8xf32>, vector<16x8xf32>, vector<16x16xf32> -> vector<16x16xf32>
    "tpu.trace_stop"() : () -> ()
    %cst_40 = arith.constant 0.353553385 : f32
    %97 = vector.broadcast %cst_40 : f32 to vector<16x16xf32>
    %98 = arith.mulf %96, %97 : vector<16x16xf32>
    %99 = vector.broadcast %25 : vector<1x16xf32> to vector<16x16xf32>
    %100 = arith.addf %98, %99 : vector<16x16xf32>
    %cst_41 = arith.constant dense<0xFF800000> : vector<16xf32>
    %101 = vector.multi_reduction <maximumf>, %100, %cst_41 [1] : vector<16x16xf32> to vector<16xf32>
    %102 = vector.shape_cast %101 : vector<16xf32> to vector<16x1xf32>
    %103 = vector.broadcast %102 : vector<16x1xf32> to vector<16x16xf32>
    %104 = arith.subf %100, %103 : vector<16x16xf32>
    %105 = math.exp %104 : vector<16x16xf32>
    %cst_42 = arith.constant dense<0.000000e+00> : vector<16xf32>
    %106 = vector.multi_reduction <add>, %105, %cst_42 [1] : vector<16x16xf32> to vector<16xf32>
    %107 = vector.shape_cast %106 : vector<16xf32> to vector<16x1xf32>
    %108 = tpu.reciprocal %107 {approx = true} : vector<16x1xf32> -> vector<16x1xf32>
    %109 = vector.broadcast %108 : vector<16x1xf32> to vector<16x16xf32>
    %110 = arith.mulf %105, %109 : vector<16x16xf32>
    %cst_43 = arith.constant dense<0.000000e+00> : vector<16x8xf32>
    %111 = tpu.matmul %110, %95, %cst_43 {dimension_numbers = #tpu.dot_dimension_numbers<[1], [0], [0], [1], [0, 0, 1, 1], [], []>} : vector<16x16xf32>, vector<16x8xf32>, vector<16x8xf32> -> vector<16x8xf32>
    %c0_44 = arith.constant 0 : index
    %c24 = arith.constant 24 : index
    %112 = vector.load %arg22[%c0_44, %c24] : memref<16x32xf32, #tpu.memory_space<vmem>>, vector<16x8xf32>
    tpu.vector_store %arg22[%c0_44, %c24], %111 {strides = array<i32>} : memref<16x32xf32, #tpu.memory_space<vmem>>, vector<16x8xf32>,
    %c0_45 = arith.constant 0 : index
    %c0_46 = arith.constant 0 : index
    %113 = vector.load %arg22[%c0_45, %c0_46] : memref<16x32xf32, #tpu.memory_space<vmem>>, vector<16x32xf32>
    %c0_47 = arith.constant 0 : index
    %c0_48 = arith.constant 0 : index
    %c0_49 = arith.constant 0 : index
    %114 = vector.load %arg9[%c0_47, %c0_48, %c0_49] : memref<2x32x32xf32, #tpu.memory_space<vmem>>, vector<1x32x32xf32>
    %115 = vector.shape_cast %114 : vector<1x32x32xf32> to vector<32x32xf32>
    %cst_50 = arith.constant dense<0.000000e+00> : vector<16x32xf32>
    %116 = tpu.matmul %113, %115, %cst_50 {dimension_numbers = #tpu.dot_dimension_numbers<[1], [0], [0], [1], [0, 0, 1, 1], [], []>} : vector<16x32xf32>, vector<32x32xf32>, vector<16x32xf32> -> vector<16x32xf32>
    %c0_51 = arith.constant 0 : index
    %c0_52 = arith.constant 0 : index
    %c0_53 = arith.constant 0 : index
    %117 = vector.load %arg10[%c0_51, %c0_52, %c0_53] : memref<2x1x32xf32, #tpu.memory_space<vmem>>, vector<1x1x32xf32>
    %118 = vector.shape_cast %117 : vector<1x1x32xf32> to vector<1x32xf32>
    %119 = vector.broadcast %118 : vector<1x32xf32> to vector<16x32xf32>
    %120 = arith.addf %116, %119 : vector<16x32xf32>
    %121 = arith.addf %120, %23 : vector<16x32xf32>
    %c0_54 = arith.constant 0 : index
    %c0_55 = arith.constant 0 : index
    %c0_56 = arith.constant 0 : index
    %122 = vector.load %arg11[%c0_54, %c0_55, %c0_56] : memref<2x1x32xf32, #tpu.memory_space<vmem>>, vector<1x1x32xf32>
    %123 = vector.shape_cast %122 : vector<1x1x32xf32> to vector<1x32xf32>
    %c0_57 = arith.constant 0 : index
    %c0_58 = arith.constant 0 : index
    %c0_59 = arith.constant 0 : index
    %124 = vector.load %arg12[%c0_57, %c0_58, %c0_59] : memref<2x1x32xf32, #tpu.memory_space<vmem>>, vector<1x1x32xf32>
    %125 = vector.shape_cast %124 : vector<1x1x32xf32> to vector<1x32xf32>
    %cst_60 = arith.constant dense<0.000000e+00> : vector<16xf32>
    %126 = vector.multi_reduction <add>, %121, %cst_60 [1] : vector<16x32xf32> to vector<16xf32>
    %127 = vector.shape_cast %126 : vector<16xf32> to vector<16x1xf32>
    %cst_61 = arith.constant 3.200000e+01 : f32
    %128 = vector.broadcast %cst_61 : f32 to vector<16x1xf32>
    %129 = arith.divf %127, %128 : vector<16x1xf32>
    %130 = vector.broadcast %129 : vector<16x1xf32> to vector<16x32xf32>
    %131 = arith.subf %121, %130 : vector<16x32xf32>
    %132 = arith.mulf %131, %131 : vector<16x32xf32>
    %cst_62 = arith.constant dense<0.000000e+00> : vector<16xf32>
    %133 = vector.multi_reduction <add>, %132, %cst_62 [1] : vector<16x32xf32> to vector<16xf32>
    %134 = vector.shape_cast %133 : vector<16xf32> to vector<16x1xf32>
    %cst_63 = arith.constant 3.200000e+01 : f32
    %135 = vector.broadcast %cst_63 : f32 to vector<16x1xf32>
    %136 = arith.divf %134, %135 : vector<16x1xf32>
    %cst_64 = arith.constant 9.99999974E-6 : f32
    %137 = vector.broadcast %cst_64 : f32 to vector<16x1xf32>
    %138 = arith.addf %136, %137 : vector<16x1xf32>
    %139 = math.rsqrt %138 : vector<16x1xf32>
    %140 = vector.broadcast %139 : vector<16x1xf32> to vector<16x32xf32>
    %141 = arith.mulf %131, %140 : vector<16x32xf32>
    %142 = vector.broadcast %123 : vector<1x32xf32> to vector<16x32xf32>
    %143 = arith.mulf %141, %142 : vector<16x32xf32>
    %144 = vector.broadcast %125 : vector<1x32xf32> to vector<16x32xf32>
    %145 = arith.addf %143, %144 : vector<16x32xf32>
    %c0_65 = arith.constant 0 : index
    %c0_66 = arith.constant 0 : index
    %c0_67 = arith.constant 0 : index
    %146 = vector.load %arg13[%c0_65, %c0_66, %c0_67] : memref<2x32x64xf32, #tpu.memory_space<vmem>>, vector<1x32x64xf32>
    %147 = vector.shape_cast %146 : vector<1x32x64xf32> to vector<32x64xf32>
    %cst_68 = arith.constant dense<0.000000e+00> : vector<16x64xf32>
    %148 = tpu.matmul %145, %147, %cst_68 {dimension_numbers = #tpu.dot_dimension_numbers<[1], [0], [0], [1], [0, 0, 1, 1], [], []>} : vector<16x32xf32>, vector<32x64xf32>, vector<16x64xf32> -> vector<16x64xf32>
    %c0_69 = arith.constant 0 : index
    %c0_70 = arith.constant 0 : index
    %c0_71 = arith.constant 0 : index
    %149 = vector.load %arg14[%c0_69, %c0_70, %c0_71] : memref<2x1x64xf32, #tpu.memory_space<vmem>>, vector<1x1x64xf32>
    %150 = vector.shape_cast %149 : vector<1x1x64xf32> to vector<1x64xf32>
    %151 = vector.broadcast %150 : vector<1x64xf32> to vector<16x64xf32>
    %152 = arith.addf %148, %151 : vector<16x64xf32>
    %153 = arith.mulf %152, %152 : vector<16x64xf32>
    %154 = arith.mulf %152, %153 : vector<16x64xf32>
    %cst_72 = arith.constant 4.471500e-02 : f32
    %155 = vector.broadcast %cst_72 : f32 to vector<16x64xf32>
    %156 = arith.mulf %155, %154 : vector<16x64xf32>
    %157 = arith.addf %152, %156 : vector<16x64xf32>
    %cst_73 = arith.constant 0.797884583 : f32
    %158 = vector.broadcast %cst_73 : f32 to vector<16x64xf32>
    %159 = arith.mulf %158, %157 : vector<16x64xf32>
    %160 = math.tanh %159 : vector<16x64xf32>
    %cst_74 = arith.constant 1.000000e+00 : f32
    %161 = vector.broadcast %cst_74 : f32 to vector<16x64xf32>
    %162 = arith.addf %161, %160 : vector<16x64xf32>
    %cst_75 = arith.constant 5.000000e-01 : f32
    %163 = vector.broadcast %cst_75 : f32 to vector<16x64xf32>
    %164 = arith.mulf %163, %162 : vector<16x64xf32>
    %165 = arith.mulf %152, %164 : vector<16x64xf32>
    %c0_76 = arith.constant 0 : index
    %c0_77 = arith.constant 0 : index
    %c0_78 = arith.constant 0 : index
    %166 = vector.load %arg15[%c0_76, %c0_77, %c0_78] : memref<2x64x32xf32, #tpu.memory_space<vmem>>, vector<1x64x32xf32>
    %167 = vector.shape_cast %166 : vector<1x64x32xf32> to vector<64x32xf32>
    %cst_79 = arith.constant dense<0.000000e+00> : vector<16x32xf32>
    %168 = tpu.matmul %165, %167, %cst_79 {dimension_numbers = #tpu.dot_dimension_numbers<[1], [0], [0], [1], [0, 0, 1, 1], [], []>} : vector<16x64xf32>, vector<64x32xf32>, vector<16x32xf32> -> vector<16x32xf32>
    %c0_80 = arith.constant 0 : index
    %c0_81 = arith.constant 0 : index
    %c0_82 = arith.constant 0 : index
    %169 = vector.load %arg16[%c0_80, %c0_81, %c0_82] : memref<2x1x32xf32, #tpu.memory_space<vmem>>, vector<1x1x32xf32>
    %170 = vector.shape_cast %169 : vector<1x1x32xf32> to vector<1x32xf32>
    %171 = vector.broadcast %170 : vector<1x32xf32> to vector<16x32xf32>
    %172 = arith.addf %168, %171 : vector<16x32xf32>
    %173 = arith.addf %172, %145 : vector<16x32xf32>
    %c0_83 = arith.constant 0 : index
    %c0_84 = arith.constant 0 : index
    %c0_85 = arith.constant 0 : index
    %174 = vector.load %arg17[%c0_83, %c0_84, %c0_85] : memref<2x1x32xf32, #tpu.memory_space<vmem>>, vector<1x1x32xf32>
    %175 = vector.shape_cast %174 : vector<1x1x32xf32> to vector<1x32xf32>
    %c0_86 = arith.constant 0 : index
    %c0_87 = arith.constant 0 : index
    %c0_88 = arith.constant 0 : index
    %176 = vector.load %arg18[%c0_86, %c0_87, %c0_88] : memref<2x1x32xf32, #tpu.memory_space<vmem>>, vector<1x1x32xf32>
    %177 = vector.shape_cast %176 : vector<1x1x32xf32> to vector<1x32xf32>
    %cst_89 = arith.constant dense<0.000000e+00> : vector<16xf32>
    %178 = vector.multi_reduction <add>, %173, %cst_89 [1] : vector<16x32xf32> to vector<16xf32>
    %179 = vector.shape_cast %178 : vector<16xf32> to vector<16x1xf32>
    %cst_90 = arith.constant 3.200000e+01 : f32
    %180 = vector.broadcast %cst_90 : f32 to vector<16x1xf32>
    %181 = arith.divf %179, %180 : vector<16x1xf32>
    %182 = vector.broadcast %181 : vector<16x1xf32> to vector<16x32xf32>
    %183 = arith.subf %173, %182 : vector<16x32xf32>
    %184 = arith.mulf %183, %183 : vector<16x32xf32>
    %cst_91 = arith.constant dense<0.000000e+00> : vector<16xf32>
    %185 = vector.multi_reduction <add>, %184, %cst_91 [1] : vector<16x32xf32> to vector<16xf32>
    %186 = vector.shape_cast %185 : vector<16xf32> to vector<16x1xf32>
    %cst_92 = arith.constant 3.200000e+01 : f32
    %187 = vector.broadcast %cst_92 : f32 to vector<16x1xf32>
    %188 = arith.divf %186, %187 : vector<16x1xf32>
    %cst_93 = arith.constant 9.99999974E-6 : f32
    %189 = vector.broadcast %cst_93 : f32 to vector<16x1xf32>
    %190 = arith.addf %188, %189 : vector<16x1xf32>
    %191 = math.rsqrt %190 : vector<16x1xf32>
    %192 = vector.broadcast %191 : vector<16x1xf32> to vector<16x32xf32>
    %193 = arith.mulf %183, %192 : vector<16x32xf32>
    %194 = vector.broadcast %175 : vector<1x32xf32> to vector<16x32xf32>
    %195 = arith.mulf %193, %194 : vector<16x32xf32>
    %196 = vector.broadcast %177 : vector<1x32xf32> to vector<16x32xf32>
    %197 = arith.addf %195, %196 : vector<16x32xf32>
    %c1 = arith.constant 1 : index
    %c0_94 = arith.constant 0 : index
    %c0_95 = arith.constant 0 : index
    %198 = vector.load %arg7[%c1, %c0_94, %c0_95] : memref<2x32x96xf32, #tpu.memory_space<vmem>>, vector<1x32x96xf32>
    %199 = vector.shape_cast %198 : vector<1x32x96xf32> to vector<32x96xf32>
    %cst_96 = arith.constant dense<0.000000e+00> : vector<16x96xf32>
    %200 = tpu.matmul %197, %199, %cst_96 {dimension_numbers = #tpu.dot_dimension_numbers<[1], [0], [0], [1], [0, 0, 1, 1], [], []>} : vector<16x32xf32>, vector<32x96xf32>, vector<16x96xf32> -> vector<16x96xf32>
    %c1_97 = arith.constant 1 : index
    %c0_98 = arith.constant 0 : index
    %c0_99 = arith.constant 0 : index
    %201 = vector.load %arg8[%c1_97, %c0_98, %c0_99] : memref<2x1x96xf32, #tpu.memory_space<vmem>>, vector<1x1x96xf32>
    %202 = vector.shape_cast %201 : vector<1x1x96xf32> to vector<1x96xf32>
    %203 = vector.broadcast %202 : vector<1x96xf32> to vector<16x96xf32>
    %204 = arith.addf %200, %203 : vector<16x96xf32>
    %205 = vector.extract_strided_slice %204 {offsets = [0, 0], sizes = [16, 8], strides = [1, 1]} : vector<16x96xf32> to vector<16x8xf32>
    %206 = vector.extract_strided_slice %204 {offsets = [0, 32], sizes = [16, 8], strides = [1, 1]} : vector<16x96xf32> to vector<16x8xf32>
    %207 = vector.extract_strided_slice %204 {offsets = [0, 64], sizes = [16, 8], strides = [1, 1]} : vector<16x96xf32> to vector<16x8xf32>
    "tpu.trace_start"() <{level = 10 : i32, message = "qd,kd->qk"}> : () -> ()
    %cst_100 = arith.constant dense<0.000000e+00> : vector<16x16xf32>
    %208 = tpu.matmul %205, %206, %cst_100 {dimension_numbers = #tpu.dot_dimension_numbers<[1], [1], [0], [0], [0, 0, 1, 0], [], []>} : vector<16x8xf32>, vector<16x8xf32>, vector<16x16xf32> -> vector<16x16xf32>
    "tpu.trace_stop"() : () -> ()
    %cst_101 = arith.constant 0.353553385 : f32
    %209 = vector.broadcast %cst_101 : f32 to vector<16x16xf32>
    %210 = arith.mulf %208, %209 : vector<16x16xf32>
    %211 = vector.broadcast %25 : vector<1x16xf32> to vector<16x16xf32>
    %212 = arith.addf %210, %211 : vector<16x16xf32>
    %cst_102 = arith.constant dense<0xFF800000> : vector<16xf32>
    %213 = vector.multi_reduction <maximumf>, %212, %cst_102 [1] : vector<16x16xf32> to vector<16xf32>
    %214 = vector.shape_cast %213 : vector<16xf32> to vector<16x1xf32>
    %215 = vector.broadcast %214 : vector<16x1xf32> to vector<16x16xf32>
    %216 = arith.subf %212, %215 : vector<16x16xf32>
    %217 = math.exp %216 : vector<16x16xf32>
    %cst_103 = arith.constant dense<0.000000e+00> : vector<16xf32>
    %218 = vector.multi_reduction <add>, %217, %cst_103 [1] : vector<16x16xf32> to vector<16xf32>
    %219 = vector.shape_cast %218 : vector<16xf32> to vector<16x1xf32>
    %220 = tpu.reciprocal %219 {approx = true} : vector<16x1xf32> -> vector<16x1xf32>
    %221 = vector.broadcast %220 : vector<16x1xf32> to vector<16x16xf32>
    %222 = arith.mulf %217, %221 : vector<16x16xf32>
    %cst_104 = arith.constant dense<0.000000e+00> : vector<16x8xf32>
    %223 = tpu.matmul %222, %207, %cst_104 {dimension_numbers = #tpu.dot_dimension_numbers<[1], [0], [0], [1], [0, 0, 1, 1], [], []>} : vector<16x16xf32>, vector<16x8xf32>, vector<16x8xf32> -> vector<16x8xf32>
    %c0_105 = arith.constant 0 : index
    %c0_106 = arith.constant 0 : index
    %224 = vector.load %arg22[%c0_105, %c0_106] : memref<16x32xf32, #tpu.memory_space<vmem>>, vector<16x8xf32>
    tpu.vector_store %arg22[%c0_105, %c0_106], %223 {strides = array<i32>} : memref<16x32xf32, #tpu.memory_space<vmem>>, vector<16x8xf32>,
    %225 = vector.extract_strided_slice %204 {offsets = [0, 8], sizes = [16, 8], strides = [1, 1]} : vector<16x96xf32> to vector<16x8xf32>
    %226 = vector.extract_strided_slice %204 {offsets = [0, 40], sizes = [16, 8], strides = [1, 1]} : vector<16x96xf32> to vector<16x8xf32>
    %227 = vector.extract_strided_slice %204 {offsets = [0, 72], sizes = [16, 8], strides = [1, 1]} : vector<16x96xf32> to vector<16x8xf32>
    "tpu.trace_start"() <{level = 10 : i32, message = "qd,kd->qk"}> : () -> ()
    %cst_107 = arith.constant dense<0.000000e+00> : vector<16x16xf32>
    %228 = tpu.matmul %225, %226, %cst_107 {dimension_numbers = #tpu.dot_dimension_numbers<[1], [1], [0], [0], [0, 0, 1, 0], [], []>} : vector<16x8xf32>, vector<16x8xf32>, vector<16x16xf32> -> vector<16x16xf32>
    "tpu.trace_stop"() : () -> ()
    %cst_108 = arith.constant 0.353553385 : f32
    %229 = vector.broadcast %cst_108 : f32 to vector<16x16xf32>
    %230 = arith.mulf %228, %229 : vector<16x16xf32>
    %231 = vector.broadcast %25 : vector<1x16xf32> to vector<16x16xf32>
    %232 = arith.addf %230, %231 : vector<16x16xf32>
    %cst_109 = arith.constant dense<0xFF800000> : vector<16xf32>
    %233 = vector.multi_reduction <maximumf>, %232, %cst_109 [1] : vector<16x16xf32> to vector<16xf32>
    %234 = vector.shape_cast %233 : vector<16xf32> to vector<16x1xf32>
    %235 = vector.broadcast %234 : vector<16x1xf32> to vector<16x16xf32>
    %236 = arith.subf %232, %235 : vector<16x16xf32>
    %237 = math.exp %236 : vector<16x16xf32>
    %cst_110 = arith.constant dense<0.000000e+00> : vector<16xf32>
    %238 = vector.multi_reduction <add>, %237, %cst_110 [1] : vector<16x16xf32> to vector<16xf32>
    %239 = vector.shape_cast %238 : vector<16xf32> to vector<16x1xf32>
    %240 = tpu.reciprocal %239 {approx = true} : vector<16x1xf32> -> vector<16x1xf32>
    %241 = vector.broadcast %240 : vector<16x1xf32> to vector<16x16xf32>
    %242 = arith.mulf %237, %241 : vector<16x16xf32>
    %cst_111 = arith.constant dense<0.000000e+00> : vector<16x8xf32>
    %243 = tpu.matmul %242, %227, %cst_111 {dimension_numbers = #tpu.dot_dimension_numbers<[1], [0], [0], [1], [0, 0, 1, 1], [], []>} : vector<16x16xf32>, vector<16x8xf32>, vector<16x8xf32> -> vector<16x8xf32>
    %c0_112 = arith.constant 0 : index
    %c8_113 = arith.constant 8 : index
    %244 = vector.load %arg22[%c0_112, %c8_113] : memref<16x32xf32, #tpu.memory_space<vmem>>, vector<16x8xf32>
    tpu.vector_store %arg22[%c0_112, %c8_113], %243 {strides = array<i32>} : memref<16x32xf32, #tpu.memory_space<vmem>>, vector<16x8xf32>,
    %245 = vector.extract_strided_slice %204 {offsets = [0, 16], sizes = [16, 8], strides = [1, 1]} : vector<16x96xf32> to vector<16x8xf32>
    %246 = vector.extract_strided_slice %204 {offsets = [0, 48], sizes = [16, 8], strides = [1, 1]} : vector<16x96xf32> to vector<16x8xf32>
    %247 = vector.extract_strided_slice %204 {offsets = [0, 80], sizes = [16, 8], strides = [1, 1]} : vector<16x96xf32> to vector<16x8xf32>
    "tpu.trace_start"() <{level = 10 : i32, message = "qd,kd->qk"}> : () -> ()
    %cst_114 = arith.constant dense<0.000000e+00> : vector<16x16xf32>
    %248 = tpu.matmul %245, %246, %cst_114 {dimension_numbers = #tpu.dot_dimension_numbers<[1], [1], [0], [0], [0, 0, 1, 0], [], []>} : vector<16x8xf32>, vector<16x8xf32>, vector<16x16xf32> -> vector<16x16xf32>
    "tpu.trace_stop"() : () -> ()
    %cst_115 = arith.constant 0.353553385 : f32
    %249 = vector.broadcast %cst_115 : f32 to vector<16x16xf32>
    %250 = arith.mulf %248, %249 : vector<16x16xf32>
    %251 = vector.broadcast %25 : vector<1x16xf32> to vector<16x16xf32>
    %252 = arith.addf %250, %251 : vector<16x16xf32>
    %cst_116 = arith.constant dense<0xFF800000> : vector<16xf32>
    %253 = vector.multi_reduction <maximumf>, %252, %cst_116 [1] : vector<16x16xf32> to vector<16xf32>
    %254 = vector.shape_cast %253 : vector<16xf32> to vector<16x1xf32>
    %255 = vector.broadcast %254 : vector<16x1xf32> to vector<16x16xf32>
    %256 = arith.subf %252, %255 : vector<16x16xf32>
    %257 = math.exp %256 : vector<16x16xf32>
    %cst_117 = arith.constant dense<0.000000e+00> : vector<16xf32>
    %258 = vector.multi_reduction <add>, %257, %cst_117 [1] : vector<16x16xf32> to vector<16xf32>
    %259 = vector.shape_cast %258 : vector<16xf32> to vector<16x1xf32>
    %260 = tpu.reciprocal %259 {approx = true} : vector<16x1xf32> -> vector<16x1xf32>
    %261 = vector.broadcast %260 : vector<16x1xf32> to vector<16x16xf32>
    %262 = arith.mulf %257, %261 : vector<16x16xf32>
    %cst_118 = arith.constant dense<0.000000e+00> : vector<16x8xf32>
    %263 = tpu.matmul %262, %247, %cst_118 {dimension_numbers = #tpu.dot_dimension_numbers<[1], [0], [0], [1], [0, 0, 1, 1], [], []>} : vector<16x16xf32>, vector<16x8xf32>, vector<16x8xf32> -> vector<16x8xf32>
    %c0_119 = arith.constant 0 : index
    %c16_120 = arith.constant 16 : index
    %264 = vector.load %arg22[%c0_119, %c16_120] : memref<16x32xf32, #tpu.memory_space<vmem>>, vector<16x8xf32>
    tpu.vector_store %arg22[%c0_119, %c16_120], %263 {strides = array<i32>} : memref<16x32xf32, #tpu.memory_space<vmem>>, vector<16x8xf32>,
    %265 = vector.extract_strided_slice %204 {offsets = [0, 24], sizes = [16, 8], strides = [1, 1]} : vector<16x96xf32> to vector<16x8xf32>
    %266 = vector.extract_strided_slice %204 {offsets = [0, 56], sizes = [16, 8], strides = [1, 1]} : vector<16x96xf32> to vector<16x8xf32>
    %267 = vector.extract_strided_slice %204 {offsets = [0, 88], sizes = [16, 8], strides = [1, 1]} : vector<16x96xf32> to vector<16x8xf32>
    "tpu.trace_start"() <{level = 10 : i32, message = "qd,kd->qk"}> : () -> ()
    %cst_121 = arith.constant dense<0.000000e+00> : vector<16x16xf32>
    %268 = tpu.matmul %265, %266, %cst_121 {dimension_numbers = #tpu.dot_dimension_numbers<[1], [1], [0], [0], [0, 0, 1, 0], [], []>} : vector<16x8xf32>, vector<16x8xf32>, vector<16x16xf32> -> vector<16x16xf32>
    "tpu.trace_stop"() : () -> ()
    %cst_122 = arith.constant 0.353553385 : f32
    %269 = vector.broadcast %cst_122 : f32 to vector<16x16xf32>
    %270 = arith.mulf %268, %269 : vector<16x16xf32>
    %271 = vector.broadcast %25 : vector<1x16xf32> to vector<16x16xf32>
    %272 = arith.addf %270, %271 : vector<16x16xf32>
    %cst_123 = arith.constant dense<0xFF800000> : vector<16xf32>
    %273 = vector.multi_reduction <maximumf>, %272, %cst_123 [1] : vector<16x16xf32> to vector<16xf32>
    %274 = vector.shape_cast %273 : vector<16xf32> to vector<16x1xf32>
    %275 = vector.broadcast %274 : vector<16x1xf32> to vector<16x16xf32>
    %276 = arith.subf %272, %275 : vector<16x16xf32>
    %277 = math.exp %276 : vector<16x16xf32>
    %cst_124 = arith.constant dense<0.000000e+00> : vector<16xf32>
    %278 = vector.multi_reduction <add>, %277, %cst_124 [1] : vector<16x16xf32> to vector<16xf32>
    %279 = vector.shape_cast %278 : vector<16xf32> to vector<16x1xf32>
    %280 = tpu.reciprocal %279 {approx = true} : vector<16x1xf32> -> vector<16x1xf32>
    %281 = vector.broadcast %280 : vector<16x1xf32> to vector<16x16xf32>
    %282 = arith.mulf %277, %281 : vector<16x16xf32>
    %cst_125 = arith.constant dense<0.000000e+00> : vector<16x8xf32>
    %283 = tpu.matmul %282, %267, %cst_125 {dimension_numbers = #tpu.dot_dimension_numbers<[1], [0], [0], [1], [0, 0, 1, 1], [], []>} : vector<16x16xf32>, vector<16x8xf32>, vector<16x8xf32> -> vector<16x8xf32>
    %c0_126 = arith.constant 0 : index
    %c24_127 = arith.constant 24 : index
    %284 = vector.load %arg22[%c0_126, %c24_127] : memref<16x32xf32, #tpu.memory_space<vmem>>, vector<16x8xf32>
    tpu.vector_store %arg22[%c0_126, %c24_127], %283 {strides = array<i32>} : memref<16x32xf32, #tpu.memory_space<vmem>>, vector<16x8xf32>,
    %c0_128 = arith.constant 0 : index
    %c0_129 = arith.constant 0 : index
    %285 = vector.load %arg22[%c0_128, %c0_129] : memref<16x32xf32, #tpu.memory_space<vmem>>, vector<16x32xf32>
    %c1_130 = arith.constant 1 : index
    %c0_131 = arith.constant 0 : index
    %c0_132 = arith.constant 0 : index
    %286 = vector.load %arg9[%c1_130, %c0_131, %c0_132] : memref<2x32x32xf32, #tpu.memory_space<vmem>>, vector<1x32x32xf32>
    %287 = vector.shape_cast %286 : vector<1x32x32xf32> to vector<32x32xf32>
    %cst_133 = arith.constant dense<0.000000e+00> : vector<16x32xf32>
    %288 = tpu.matmul %285, %287, %cst_133 {dimension_numbers = #tpu.dot_dimension_numbers<[1], [0], [0], [1], [0, 0, 1, 1], [], []>} : vector<16x32xf32>, vector<32x32xf32>, vector<16x32xf32> -> vector<16x32xf32>
    %c1_134 = arith.constant 1 : index
    %c0_135 = arith.constant 0 : index
    %c0_136 = arith.constant 0 : index
    %289 = vector.load %arg10[%c1_134, %c0_135, %c0_136] : memref<2x1x32xf32, #tpu.memory_space<vmem>>, vector<1x1x32xf32>
    %290 = vector.shape_cast %289 : vector<1x1x32xf32> to vector<1x32xf32>
    %291 = vector.broadcast %290 : vector<1x32xf32> to vector<16x32xf32>
    %292 = arith.addf %288, %291 : vector<16x32xf32>
    %293 = arith.addf %292, %197 : vector<16x32xf32>
    %c1_137 = arith.constant 1 : index
    %c0_138 = arith.constant 0 : index
    %c0_139 = arith.constant 0 : index
    %294 = vector.load %arg11[%c1_137, %c0_138, %c0_139] : memref<2x1x32xf32, #tpu.memory_space<vmem>>, vector<1x1x32xf32>
    %295 = vector.shape_cast %294 : vector<1x1x32xf32> to vector<1x32xf32>
    %c1_140 = arith.constant 1 : index
    %c0_141 = arith.constant 0 : index
    %c0_142 = arith.constant 0 : index
    %296 = vector.load %arg12[%c1_140, %c0_141, %c0_142] : memref<2x1x32xf32, #tpu.memory_space<vmem>>, vector<1x1x32xf32>
    %297 = vector.shape_cast %296 : vector<1x1x32xf32> to vector<1x32xf32>
    %cst_143 = arith.constant dense<0.000000e+00> : vector<16xf32>
    %298 = vector.multi_reduction <add>, %293, %cst_143 [1] : vector<16x32xf32> to vector<16xf32>
    %299 = vector.shape_cast %298 : vector<16xf32> to vector<16x1xf32>
    %cst_144 = arith.constant 3.200000e+01 : f32
    %300 = vector.broadcast %cst_144 : f32 to vector<16x1xf32>
    %301 = arith.divf %299, %300 : vector<16x1xf32>
    %302 = vector.broadcast %301 : vector<16x1xf32> to vector<16x32xf32>
    %303 = arith.subf %293, %302 : vector<16x32xf32>
    %304 = arith.mulf %303, %303 : vector<16x32xf32>
    %cst_145 = arith.constant dense<0.000000e+00> : vector<16xf32>
    %305 = vector.multi_reduction <add>, %304, %cst_145 [1] : vector<16x32xf32> to vector<16xf32>
    %306 = vector.shape_cast %305 : vector<16xf32> to vector<16x1xf32>
    %cst_146 = arith.constant 3.200000e+01 : f32
    %307 = vector.broadcast %cst_146 : f32 to vector<16x1xf32>
    %308 = arith.divf %306, %307 : vector<16x1xf32>
    %cst_147 = arith.constant 9.99999974E-6 : f32
    %309 = vector.broadcast %cst_147 : f32 to vector<16x1xf32>
    %310 = arith.addf %308, %309 : vector<16x1xf32>
    %311 = math.rsqrt %310 : vector<16x1xf32>
    %312 = vector.broadcast %311 : vector<16x1xf32> to vector<16x32xf32>
    %313 = arith.mulf %303, %312 : vector<16x32xf32>
    %314 = vector.broadcast %295 : vector<1x32xf32> to vector<16x32xf32>
    %315 = arith.mulf %313, %314 : vector<16x32xf32>
    %316 = vector.broadcast %297 : vector<1x32xf32> to vector<16x32xf32>
    %317 = arith.addf %315, %316 : vector<16x32xf32>
    %c1_148 = arith.constant 1 : index
    %c0_149 = arith.constant 0 : index
    %c0_150 = arith.constant 0 : index
    %318 = vector.load %arg13[%c1_148, %c0_149, %c0_150] : memref<2x32x64xf32, #tpu.memory_space<vmem>>, vector<1x32x64xf32>
    %319 = vector.shape_cast %318 : vector<1x32x64xf32> to vector<32x64xf32>
    %cst_151 = arith.constant dense<0.000000e+00> : vector<16x64xf32>
    %320 = tpu.matmul %317, %319, %cst_151 {dimension_numbers = #tpu.dot_dimension_numbers<[1], [0], [0], [1], [0, 0, 1, 1], [], []>} : vector<16x32xf32>, vector<32x64xf32>, vector<16x64xf32> -> vector<16x64xf32>
    %c1_152 = arith.constant 1 : index
    %c0_153 = arith.constant 0 : index
    %c0_154 = arith.constant 0 : index
    %321 = vector.load %arg14[%c1_152, %c0_153, %c0_154] : memref<2x1x64xf32, #tpu.memory_space<vmem>>, vector<1x1x64xf32>
    %322 = vector.shape_cast %321 : vector<1x1x64xf32> to vector<1x64xf32>
    %323 = vector.broadcast %322 : vector<1x64xf32> to vector<16x64xf32>
    %324 = arith.addf %320, %323 : vector<16x64xf32>
    %325 = arith.mulf %324, %324 : vector<16x64xf32>
    %326 = arith.mulf %324, %325 : vector<16x64xf32>
    %cst_155 = arith.constant 4.471500e-02 : f32
    %327 = vector.broadcast %cst_155 : f32 to vector<16x64xf32>
    %328 = arith.mulf %327, %326 : vector<16x64xf32>
    %329 = arith.addf %324, %328 : vector<16x64xf32>
    %cst_156 = arith.constant 0.797884583 : f32
    %330 = vector.broadcast %cst_156 : f32 to vector<16x64xf32>
    %331 = arith.mulf %330, %329 : vector<16x64xf32>
    %332 = math.tanh %331 : vector<16x64xf32>
    %cst_157 = arith.constant 1.000000e+00 : f32
    %333 = vector.broadcast %cst_157 : f32 to vector<16x64xf32>
    %334 = arith.addf %333, %332 : vector<16x64xf32>
    %cst_158 = arith.constant 5.000000e-01 : f32
    %335 = vector.broadcast %cst_158 : f32 to vector<16x64xf32>
    %336 = arith.mulf %335, %334 : vector<16x64xf32>
    %337 = arith.mulf %324, %336 : vector<16x64xf32>
    %c1_159 = arith.constant 1 : index
    %c0_160 = arith.constant 0 : index
    %c0_161 = arith.constant 0 : index
    %338 = vector.load %arg15[%c1_159, %c0_160, %c0_161] : memref<2x64x32xf32, #tpu.memory_space<vmem>>, vector<1x64x32xf32>
    %339 = vector.shape_cast %338 : vector<1x64x32xf32> to vector<64x32xf32>
    %cst_162 = arith.constant dense<0.000000e+00> : vector<16x32xf32>
    %340 = tpu.matmul %337, %339, %cst_162 {dimension_numbers = #tpu.dot_dimension_numbers<[1], [0], [0], [1], [0, 0, 1, 1], [], []>} : vector<16x64xf32>, vector<64x32xf32>, vector<16x32xf32> -> vector<16x32xf32>
    %c1_163 = arith.constant 1 : index
    %c0_164 = arith.constant 0 : index
    %c0_165 = arith.constant 0 : index
    %341 = vector.load %arg16[%c1_163, %c0_164, %c0_165] : memref<2x1x32xf32, #tpu.memory_space<vmem>>, vector<1x1x32xf32>
    %342 = vector.shape_cast %341 : vector<1x1x32xf32> to vector<1x32xf32>
    %343 = vector.broadcast %342 : vector<1x32xf32> to vector<16x32xf32>
    %344 = arith.addf %340, %343 : vector<16x32xf32>
    %345 = arith.addf %344, %317 : vector<16x32xf32>
    %c1_166 = arith.constant 1 : index
    %c0_167 = arith.constant 0 : index
    %c0_168 = arith.constant 0 : index
    %346 = vector.load %arg17[%c1_166, %c0_167, %c0_168] : memref<2x1x32xf32, #tpu.memory_space<vmem>>, vector<1x1x32xf32>
    %347 = vector.shape_cast %346 : vector<1x1x32xf32> to vector<1x32xf32>
    %c1_169 = arith.constant 1 : index
    %c0_170 = arith.constant 0 : index
    %c0_171 = arith.constant 0 : index
    %348 = vector.load %arg18[%c1_169, %c0_170, %c0_171] : memref<2x1x32xf32, #tpu.memory_space<vmem>>, vector<1x1x32xf32>
    %349 = vector.shape_cast %348 : vector<1x1x32xf32> to vector<1x32xf32>
    %cst_172 = arith.constant dense<0.000000e+00> : vector<16xf32>
    %350 = vector.multi_reduction <add>, %345, %cst_172 [1] : vector<16x32xf32> to vector<16xf32>
    %351 = vector.shape_cast %350 : vector<16xf32> to vector<16x1xf32>
    %cst_173 = arith.constant 3.200000e+01 : f32
    %352 = vector.broadcast %cst_173 : f32 to vector<16x1xf32>
    %353 = arith.divf %351, %352 : vector<16x1xf32>
    %354 = vector.broadcast %353 : vector<16x1xf32> to vector<16x32xf32>
    %355 = arith.subf %345, %354 : vector<16x32xf32>
    %356 = arith.mulf %355, %355 : vector<16x32xf32>
    %cst_174 = arith.constant dense<0.000000e+00> : vector<16xf32>
    %357 = vector.multi_reduction <add>, %356, %cst_174 [1] : vector<16x32xf32> to vector<16xf32>
    %358 = vector.shape_cast %357 : vector<16xf32> to vector<16x1xf32>
    %cst_175 = arith.constant 3.200000e+01 : f32
    %359 = vector.broadcast %cst_175 : f32 to vector<16x1xf32>
    %360 = arith.divf %358, %359 : vector<16x1xf32>
    %cst_176 = arith.constant 9.99999974E-6 : f32
    %361 = vector.broadcast %cst_176 : f32 to vector<16x1xf32>
    %362 = arith.addf %360, %361 : vector<16x1xf32>
    %363 = math.rsqrt %362 : vector<16x1xf32>
    %364 = vector.broadcast %363 : vector<16x1xf32> to vector<16x32xf32>
    %365 = arith.mulf %355, %364 : vector<16x32xf32>
    %366 = vector.broadcast %347 : vector<1x32xf32> to vector<16x32xf32>
    %367 = arith.mulf %365, %366 : vector<16x32xf32>
    %368 = vector.broadcast %349 : vector<1x32xf32> to vector<16x32xf32>
    %369 = arith.addf %367, %368 : vector<16x32xf32>
    %c0_177 = arith.constant 0 : index
    %c0_178 = arith.constant 0 : index
    %370 = vector.load %arg22[%c0_177, %c0_178] : memref<16x32xf32, #tpu.memory_space<vmem>>, vector<16x32xf32>
    tpu.vector_store %arg22[%c0_177, %c0_178], %369 {strides = array<i32>} : memref<16x32xf32, #tpu.memory_space<vmem>>, vector<16x32xf32>,
    %371 = arith.index_cast %arg0 : i32 to index
    %c0_179 = arith.constant 0 : index
    %372 = memref.load %arg1[%371, %c0_179] : memref<2x4xi32, #tpu.memory_space<smem>>
    %373 = arith.index_cast %372 : i32 to index
    %c0_180 = arith.constant 0 : index
    %374 = vector.load %arg22[%373, %c0_180] : memref<16x32xf32, #tpu.memory_space<vmem>>, vector<1x32xf32>
    %c0_181 = arith.constant 0 : index
    %c0_182 = arith.constant 0 : index
    %375 = vector.load %arg23[%c0_181, %c0_182] : memref<4x32xf32, #tpu.memory_space<vmem>>, vector<1x32xf32>
    tpu.vector_store %arg23[%c0_181, %c0_182], %374 {strides = array<i32>} : memref<4x32xf32, #tpu.memory_space<vmem>>, vector<1x32xf32>,
    %376 = arith.index_cast %arg0 : i32 to index
    %c1_183 = arith.constant 1 : index
    %377 = memref.load %arg1[%376, %c1_183] : memref<2x4xi32, #tpu.memory_space<smem>>
    %378 = arith.index_cast %377 : i32 to index
    %c0_184 = arith.constant 0 : index
    %379 = vector.load %arg22[%378, %c0_184] : memref<16x32xf32, #tpu.memory_space<vmem>>, vector<1x32xf32>
    %c1_185 = arith.constant 1 : index
    %c0_186 = arith.constant 0 : index
    %380 = vector.load %arg23[%c1_185, %c0_186] : memref<4x32xf32, #tpu.memory_space<vmem>>, vector<1x32xf32>
    tpu.vector_store %arg23[%c1_185, %c0_186], %379 {strides = array<i32>} : memref<4x32xf32, #tpu.memory_space<vmem>>, vector<1x32xf32>,
    %381 = arith.index_cast %arg0 : i32 to index
    %c2 = arith.constant 2 : index
    %382 = memref.load %arg1[%381, %c2] : memref<2x4xi32, #tpu.memory_space<smem>>
    %383 = arith.index_cast %382 : i32 to index
    %c0_187 = arith.constant 0 : index
    %384 = vector.load %arg22[%383, %c0_187] : memref<16x32xf32, #tpu.memory_space<vmem>>, vector<1x32xf32>
    %c2_188 = arith.constant 2 : index
    %c0_189 = arith.constant 0 : index
    %385 = vector.load %arg23[%c2_188, %c0_189] : memref<4x32xf32, #tpu.memory_space<vmem>>, vector<1x32xf32>
    tpu.vector_store %arg23[%c2_188, %c0_189], %384 {strides = array<i32>} : memref<4x32xf32, #tpu.memory_space<vmem>>, vector<1x32xf32>,
    %386 = arith.index_cast %arg0 : i32 to index
    %c3 = arith.constant 3 : index
    %387 = memref.load %arg1[%386, %c3] : memref<2x4xi32, #tpu.memory_space<smem>>
    %388 = arith.index_cast %387 : i32 to index
    %c0_190 = arith.constant 0 : index
    %389 = vector.load %arg22[%388, %c0_190] : memref<16x32xf32, #tpu.memory_space<vmem>>, vector<1x32xf32>
    %c3_191 = arith.constant 3 : index
    %c0_192 = arith.constant 0 : index
    %390 = vector.load %arg23[%c3_191, %c0_192] : memref<4x32xf32, #tpu.memory_space<vmem>>, vector<1x32xf32>
    tpu.vector_store %arg23[%c3_191, %c0_192], %389 {strides = array<i32>} : memref<4x32xf32, #tpu.memory_space<vmem>>, vector<1x32xf32>,
    %c0_193 = arith.constant 0 : index
    %c0_194 = arith.constant 0 : index
    %c0_195 = arith.constant 0 : index
    %391 = vector.load %arg4[%c0_193, %c0_194, %c0_195] : memref<1x4x1xf32, #tpu.memory_space<vmem>>, vector<1x4x1xf32>
    %392 = vector.shape_cast %391 : vector<1x4x1xf32> to vector<4x1xf32>
    %c0_196 = arith.constant 0 : index
    %c0_197 = arith.constant 0 : index
    %393 = vector.load %arg23[%c0_196, %c0_197] : memref<4x32xf32, #tpu.memory_space<vmem>>, vector<4x32xf32>
    %394 = vector.broadcast %392 : vector<4x1xf32> to vector<4x32xf32>
    %395 = arith.mulf %393, %394 : vector<4x32xf32>
    %c0_198 = arith.constant 0 : index
    %c0_199 = arith.constant 0 : index
    %396 = vector.load %arg19[%c0_198, %c0_199] : memref<1x32xf32, #tpu.memory_space<vmem>>, vector<1x32xf32>
    %397 = vector.broadcast %396 : vector<1x32xf32> to vector<4x32xf32>
    %398 = arith.mulf %395, %397 : vector<4x32xf32>
    %cst_200 = arith.constant dense<0.000000e+00> : vector<4xf32>
    %399 = vector.multi_reduction <add>, %398, %cst_200 [1] : vector<4x32xf32> to vector<4xf32>
    %400 = vector.shape_cast %399 : vector<4xf32> to vector<4x1xf32>
    %c0_201 = arith.constant 0 : index
    %c0_202 = arith.constant 0 : index
    %401 = vector.load %arg20[%c0_201, %c0_202] : memref<1x1xf32, #tpu.memory_space<vmem>>, vector<1x1xf32>
    %402 = vector.broadcast %401 : vector<1x1xf32> to vector<4x1xf32>
    %403 = arith.addf %400, %402 : vector<4x1xf32>
    %404 = arith.negf %403 : vector<4x1xf32>
    %405 = math.exp %404 : vector<4x1xf32>
    %cst_203 = arith.constant 1.000000e+00 : f32
    %406 = vector.broadcast %cst_203 : f32 to vector<4x1xf32>
    %407 = arith.addf %406, %405 : vector<4x1xf32>
    %408 = arith.divf %406, %407 : vector<4x1xf32>
    %409 = arith.mulf %408, %392 : vector<4x1xf32>
    %c0_204 = arith.constant 0 : index
    %c0_205 = arith.constant 0 : index
    %c0_206 = arith.constant 0 : index
    %410 = vector.load %arg21[%c0_204, %c0_205, %c0_206] : memref<1x4x1xf32, #tpu.memory_space<vmem>>, vector<1x4x1xf32>
    %411 = vector.shape_cast %410 : vector<1x4x1xf32> to vector<4x1xf32>
    %412 = vector.shape_cast %409 : vector<4x1xf32> to vector<1x4x1xf32>
    tpu.vector_store %arg21[%c0_204, %c0_205, %c0_206], %412 {strides = array<i32>} : memref<1x4x1xf32, #tpu.memory_space<vmem>>, vector<1x4x1xf32>,
    return
  }
  func.func @transform_0(%arg0: i32, %arg1: memref<2x4xi32, #tpu.memory_space<smem>>) -> (i32, i32, i32) {
    %c0_i32 = arith.constant 0 : i32
    %c0_i32_0 = arith.constant 0 : i32
    %c0_i32_1 = arith.constant 0 : i32
    return %arg0, %c0_i32, %c0_i32_0 : i32, i32, i32
  }
  func.func @transform_1(%arg0: i32, %arg1: memref<2x4xi32, #tpu.memory_space<smem>>) -> (i32, i32, i32) {
    %c0_i32 = arith.constant 0 : i32
    %c0_i32_0 = arith.constant 0 : i32
    %c0_i32_1 = arith.constant 0 : i32
    return %arg0, %c0_i32, %c0_i32_0 : i32, i32, i32
  }
  func.func @transform_2(%arg0: i32, %arg1: memref<2x4xi32, #tpu.memory_space<smem>>) -> (i32, i32, i32) {
    %c0_i32 = arith.constant 0 : i32
    %c0_i32_0 = arith.constant 0 : i32
    %c0_i32_1 = arith.constant 0 : i32
    return %arg0, %c0_i32, %c0_i32_0 : i32, i32, i32
  }
  func.func @transform_3(%arg0: i32, %arg1: memref<2x4xi32, #tpu.memory_space<smem>>) -> (i32, i32) {
    %c0_i32 = arith.constant 0 : i32
    %c0_i32_0 = arith.constant 0 : i32
    %c0_i32_1 = arith.constant 0 : i32
    return %c0_i32, %c0_i32_0 : i32, i32
  }
  func.func @transform_4(%arg0: i32, %arg1: memref<2x4xi32, #tpu.memory_space<smem>>) -> (i32, i32) {
    %c0_i32 = arith.constant 0 : i32
    %c0_i32_0 = arith.constant 0 : i32
    %c0_i32_1 = arith.constant 0 : i32
    return %c0_i32, %c0_i32_0 : i32, i32
  }
  func.func @transform_5(%arg0: i32, %arg1: memref<2x4xi32, #tpu.memory_space<smem>>) -> (i32, i32, i32) {
    %c0_i32 = arith.constant 0 : i32
    %c0_i32_0 = arith.constant 0 : i32
    %c0_i32_1 = arith.constant 0 : i32
    %c0_i32_2 = arith.constant 0 : i32
    return %c0_i32, %c0_i32_0, %c0_i32_1 : i32, i32, i32
  }
  func.func @transform_6(%arg0: i32, %arg1: memref<2x4xi32, #tpu.memory_space<smem>>) -> (i32, i32, i32) {
    %c0_i32 = arith.constant 0 : i32
    %c0_i32_0 = arith.constant 0 : i32
    %c0_i32_1 = arith.constant 0 : i32
    %c0_i32_2 = arith.constant 0 : i32
    return %c0_i32, %c0_i32_0, %c0_i32_1 : i32, i32, i32
  }
  func.func @transform_7(%arg0: i32, %arg1: memref<2x4xi32, #tpu.memory_space<smem>>) -> (i32, i32, i32) {
    %c0_i32 = arith.constant 0 : i32
    %c0_i32_0 = arith.constant 0 : i32
    %c0_i32_1 = arith.constant 0 : i32
    %c0_i32_2 = arith.constant 0 : i32
    return %c0_i32, %c0_i32_0, %c0_i32_1 : i32, i32, i32
  }
  func.func @transform_8(%arg0: i32, %arg1: memref<2x4xi32, #tpu.memory_space<smem>>) -> (i32, i32, i32) {
    %c0_i32 = arith.constant 0 : i32
    %c0_i32_0 = arith.constant 0 : i32
    %c0_i32_1 = arith.constant 0 : i32
    %c0_i32_2 = arith.constant 0 : i32
    return %c0_i32, %c0_i32_0, %c0_i32_1 : i32, i32, i32
  }
  func.func @transform_9(%arg0: i32, %arg1: memref<2x4xi32, #tpu.memory_space<smem>>) -> (i32, i32, i32) {
    %c0_i32 = arith.constant 0 : i32
    %c0_i32_0 = arith.constant 0 : i32
    %c0_i32_1 = arith.constant 0 : i32
    %c0_i32_2 = arith.constant 0 : i32
    return %c0_i32, %c0_i32_0, %c0_i32_1 : i32, i32, i32
  }
  func.func @transform_10(%arg0: i32, %arg1: memref<2x4xi32, #tpu.memory_space<smem>>) -> (i32, i32, i32) {
    %c0_i32 = arith.constant 0 : i32
    %c0_i32_0 = arith.constant 0 : i32
    %c0_i32_1 = arith.constant 0 : i32
    %c0_i32_2 = arith.constant 0 : i32
    return %c0_i32, %c0_i32_0, %c0_i32_1 : i32, i32, i32
  }
  func.func @transform_11(%arg0: i32, %arg1: memref<2x4xi32, #tpu.memory_space<smem>>) -> (i32, i32, i32) {
    %c0_i32 = arith.constant 0 : i32
    %c0_i32_0 = arith.constant 0 : i32
    %c0_i32_1 = arith.constant 0 : i32
    %c0_i32_2 = arith.constant 0 : i32
    return %c0_i32, %c0_i32_0, %c0_i32_1 : i32, i32, i32
  }
  func.func @transform_12(%arg0: i32, %arg1: memref<2x4xi32, #tpu.memory_space<smem>>) -> (i32, i32, i32) {
    %c0_i32 = arith.constant 0 : i32
    %c0_i32_0 = arith.constant 0 : i32
    %c0_i32_1 = arith.constant 0 : i32
    %c0_i32_2 = arith.constant 0 : i32
    return %c0_i32, %c0_i32_0, %c0_i32_1 : i32, i32, i32
  }
  func.func @transform_13(%arg0: i32, %arg1: memref<2x4xi32, #tpu.memory_space<smem>>) -> (i32, i32, i32) {
    %c0_i32 = arith.constant 0 : i32
    %c0_i32_0 = arith.constant 0 : i32
    %c0_i32_1 = arith.constant 0 : i32
    %c0_i32_2 = arith.constant 0 : i32
    return %c0_i32, %c0_i32_0, %c0_i32_1 : i32, i32, i32
  }
  func.func @transform_14(%arg0: i32, %arg1: memref<2x4xi32, #tpu.memory_space<smem>>) -> (i32, i32, i32) {
    %c0_i32 = arith.constant 0 : i32
    %c0_i32_0 = arith.constant 0 : i32
    %c0_i32_1 = arith.constant 0 : i32
    %c0_i32_2 = arith.constant 0 : i32
    return %c0_i32, %c0_i32_0, %c0_i32_1 : i32, i32, i32
  }
  func.func @transform_15(%arg0: i32, %arg1: memref<2x4xi32, #tpu.memory_space<smem>>) -> (i32, i32, i32) {
    %c0_i32 = arith.constant 0 : i32
    %c0_i32_0 = arith.constant 0 : i32
    %c0_i32_1 = arith.constant 0 : i32
    %c0_i32_2 = arith.constant 0 : i32
    return %c0_i32, %c0_i32_0, %c0_i32_1 : i32, i32, i32
  }
  func.func @transform_16(%arg0: i32, %arg1: memref<2x4xi32, #tpu.memory_space<smem>>) -> (i32, i32, i32) {
    %c0_i32 = arith.constant 0 : i32
    %c0_i32_0 = arith.constant 0 : i32
    %c0_i32_1 = arith.constant 0 : i32
    %c0_i32_2 = arith.constant 0 : i32
    return %c0_i32, %c0_i32_0, %c0_i32_1 : i32, i32, i32
  }
  func.func @transform_17(%arg0: i32, %arg1: memref<2x4xi32, #tpu.memory_space<smem>>) -> (i32, i32) {
    %c0_i32 = arith.constant 0 : i32
    %c0_i32_0 = arith.constant 0 : i32
    %c0_i32_1 = arith.constant 0 : i32
    return %c0_i32, %c0_i32_0 : i32, i32
  }
  func.func @transform_18(%arg0: i32, %arg1: memref<2x4xi32, #tpu.memory_space<smem>>) -> (i32, i32) {
    %c0_i32 = arith.constant 0 : i32
    %c0_i32_0 = arith.constant 0 : i32
    %c0_i32_1 = arith.constant 0 : i32
    return %c0_i32, %c0_i32_0 : i32, i32
  }
  func.func @transform_19(%arg0: i32, %arg1: memref<2x4xi32, #tpu.memory_space<smem>>) -> (i32, i32, i32) {
    %c0_i32 = arith.constant 0 : i32
    %c0_i32_0 = arith.constant 0 : i32
    %c0_i32_1 = arith.constant 0 : i32
    return %arg0, %c0_i32, %c0_i32_0 : i32, i32, i32
  }
}

</mosaic_0001>

<bundles_post_ra>
// kernel: baseline_ext_forward.1
= control target key start
LH: loop header
LB: loop body
LE: loop exit
PB: predicated region body
PF: predicated region fallthrough
CT: control target
= control target key end

     0   :  { %s4772_s0 = inlined_call_operand.vmem [shape: s32[2,4], index: 0, kind: input, shape index: {}]   ;;  %s4773_s1 = inlined_call_operand.vmem [shape: f32[2,16,32], index: 1, kind: input, shape index: {}]   ;;  %s4774_s2 = inlined_call_operand.vmem [shape: f32[2,1,16], index: 2, kind: input, shape index: {}]   ;;  %s4775_s3 = inlined_call_operand.vmem [shape: f32[2,4,1], index: 3, kind: input, shape index: {}]   ;;  %s4776_s4 = inlined_call_operand.vmem [shape: f32[1,32], index: 4, kind: input, shape index: {}]   ;;  %s4777_s5 = inlined_call_operand.vmem [shape: f32[1,32], index: 5, kind: input, shape index: {}]   ;;  %s4778_s6 = inlined_call_operand.vmem [shape: f32[2,32,96], index: 6, kind: input, shape index: {}]   ;;  %s4779_s7 = inlined_call_operand.vmem [shape: f32[2,1,96], index: 7, kind: input, shape index: {}]   ;;  %s4780_s8 = inlined_call_operand.vmem [shape: f32[2,32,32], index: 8, kind: input, shape index: {}]   ;;  %s4781_s9 = inlined_call_operand.vmem [shape: f32[2,1,32], index: 9, kind: input, shape index: {}]   ;;  %s4782_s10 = inlined_call_operand.vmem [shape: f32[2,1,32], index: 10, kind: input, shape index: {}]   ;;  %s4783_s11 = inlined_call_operand.vmem [shape: f32[2,1,32], index: 11, kind: input, shape index: {}]   ;;  %s4784_s12 = inlined_call_operand.vmem [shape: f32[2,32,64], index: 12, kind: input, shape index: {}]   ;;  %s4785_s13 = inlined_call_operand.vmem [shape: f32[2,1,64], index: 13, kind: input, shape index: {}]   ;;  %s4786_s14 = inlined_call_operand.vmem [shape: f32[2,64,32], index: 14, kind: input, shape index: {}]   ;;  %s4787_s15 = inlined_call_operand.vmem [shape: f32[2,1,32], index: 15, kind: input, shape index: {}]   ;;  %s4788_s16 = inlined_call_operand.vmem [shape: f32[2,1,32], index: 16, kind: input, shape index: {}]   ;;  %s4789_s17 = inlined_call_operand.vmem [shape: f32[2,1,32], index: 17, kind: input, shape index: {}]   ;;  %s4790_s18 = inlined_call_operand.vmem [shape: f32[1,32], index: 18, kind: input, shape index: {}]   ;;  %s4791_s20 = inlined_call_operand.vmem [shape: f32[2,4,1], index: 20, kind: output, shape index: {}]   ;;  %s4792_s19 = inlined_call_operand.<no memory space> [shape: f32[1,1], index: 19, kind: input, shape index: {}]  }
   0x1   :  { %4814 = sst [smem:[#allocation8_spill]] %s4772_s0  ;;  %v29_v0 = vstv %s4792_s19 }
   0x2   :  { %4815 = sst [smem:[#allocation9_spill]] %s4773_s1  ;;  %30 = vst [vmem:[#allocation6] sm:$0x1] %v29_v0 }
   0x3   :  { %4816 = sst [smem:[#allocation10_spill]] %s4774_s2 }
   0x4   :  { %4817 = sst [smem:[#allocation11_spill]] %s4775_s3 }
   0x5   :  { %4818 = sst [smem:[#allocation12_spill]] %s4776_s4 }
   0x6   :  { %4819 = sst [smem:[#allocation13_spill]] %s4785_s13 }
   0x7   :  { %s4820_s23 = sld [smem:[#allocation8_spill]] }
   0xd   :  { %s25_s13 = sshll.u32 %s4820_s23, 4  ;;  %s26_s13 = int_to_ptr.vmem [resolvable:$true] %s25_s13 }
   0xe   :  { %s4097_s25 = scalar_lea.vmem %s26_s13, 32  ;;  %p4102_p1 = scmp.lt.s32.totalorder %s26_s13, %s26_s13 }
   0xf   :  { %p4098_p0 = scmp.ne.s32.totalorder %s26_s13, %s4097_s25  ;;  %p4103_p2 = scmp.lt.s32.totalorder %s4097_s25, %s4097_s25 }
  0x11   :  { %p4104_p3 = por %p4103_p2, %p4102_p1 }
  0x13   :  { %p4105_p4 = pnand %p4104_p3, %p4098_p0 }
  0x15   :  { %4108 = shalt.err (!%p4105_p4)  }
  0x16   :  { %s4119_s3 = smov [#allocation5]  }
  0x17   :  { %28 = dma.vmem_to_smem %s26_s13, 32, %s4119_s3, [#allocation4] }
  0x18   :  { %4113 = dma.done.wait [#allocation4], 32 }
  0x19   :  { %4114 = vsyncadd [#allocation4], 4294967264 }
  0x1a   :  { %32 = sfence }
  0x1b   :  { %s4246_s26 = smov 0  }
  0x1c LB: > { %s4252_s19 = sadd.s32 4294967295, %s4117_s26   ;;  %p3516_p5 = scmp.ge.s32.totalorder %s4117_s26, 1  ;;  %s4117_s26 = sphi %s4246_s26, %s38_s26  }
  0x1d   : > { %p563_p6 = scmp.lt.s32.totalorder %s4117_s26, 3 }
  0x1f   : > { %p564_p7 = pnand %p3516_p5, %p563_p6 }
  0x20   : > { %p625_p8 = scmp.lt.s32.totalorder (!%p564_p7), %s4252_s19, 1  ;;  %s4821_s29 = sld [smem:[#allocation9_spill]] (!%p564_p7) }
  0x21   : > { %567 = sbr.rel (%p564_p7) target bundleno = 7455 (0x1d1f), region = 96  ;;  %s4822_s28 = sld [smem:[#allocation12_spill]] (!%p564_p7) }
  0x22   : > { %s4120_s21 = smov (!%p564_p7), 96   ;;  %s4121_s1 = smov (!%p564_p7), 120  }
  0x23   : > { %s4122_s22 = smov (!%p564_p7), 88   ;;  %s4823_s2 = sld [smem:[#allocation10_spill]] (!%p564_p7) }
  0x24   : > { %s4123_s3 = smov (!%p564_p7), 64   ;;  %s4806_s4 = smov (!%p564_p7), 112  }
  0x25   : > { %s4800_s0 = smov (!%p564_p7), 104   ;;  %s4798_s23 = smov (!%p564_p7), 40  }
  0x26   : > { %s4258_s13 = scalar_select %p625_p8, %s4252_s19, 1  ;;  %vm645_vm0 = vcmask 261120   ;;  %v693_v15 = vld [vmem:[%s4778_s6 + $0x18] sm:$0xff]  ;;  %v692_v16 = vld [vmem:[%s4778_s6 + $0x10] sm:$0xff]  ;;  %v691_v17 = vld [vmem:[%s4778_s6 + $0x8] sm:$0xff]  ;;  %vm788_vm1 = vcmask 64512  }
  0x27   : > { %3759 = vmatprep.subr.mxu1 %v693_v15  ;;  %v690_v18 = vld [vmem:[%s4778_s6] sm:$0xff]  ;;  %vm882_vm2 = vcmask 130048   ;;  %s4796_s24 = smov 8   ;;  %vm1206_vm3 = vcmask 130112   ;;  %vm1421_vm4 = vcmask 195712   ;;  %vm1636_vm5 = vcmask 261312  }
  0x28   : > { %s3638_s27 = sshll.u32 %s4258_s13, 4  ;;  %3760 = vmatpush3.msra.mxu1 %v693_v15  ;;  %v3521_v26 = vld [vmem:[%s4822_s28] ss:$0 sm:$0xff]  ;;  %s4808_s28 = smov 80   ;;  %vm1904_vm6 = vcmask 523264   ;;  %vm3380_vm7 = vcmask 253952  }
  0x29   : > { %s629_s30 = scalar_lea.vmem %s4821_s29, %s3638_s27  ;;  %3761 = vmatprep.subr.mxu1 %v692_v16  ;;  %v3522_v28 = vld [vmem:[%s4777_s5] ss:$0 sm:$0xff]  ;;  %s4331_s25 = scalar_lea.vmem %s4823_s2, %s4258_s13  ;;  %vm3413_vm8 = vcmask 257024   ;;  %vm3432_vm9 = vcmask 3072  }
  0x2a   : > { %v641_v1 = vld [vmem:[%s629_s30] sm:$0xff]  ;;  %v642_v2 = vld [vmem:[%s629_s30 + $0x8] sm:$0xff]  ;;  %3762 = vmatpush3.msra.mxu1 %v692_v16  ;;  %s4812_s27 = smov 56   ;;  %s4804_s29 = smov 48  }
  0x2b   : > { %v646_v3 = vsel %vm645_vm0, %v641_v1, 0.0  ;;  %v649_v4 = vsel %vm645_vm0, %v642_v2, 0.0  ;;  %3763 = vmatprep.subr.mxu1 %v691_v17  ;;  %v3523_v35 = vld [vmem:[%s4779_s7] ss:$0 sm:$0xff]  ;;  %s4802_s30 = smov 72   ;;  %s4794_s2 = smov 16  }
  0x2c   : > { %647 = vadd.xlane.f32.xlu0 %v646_v3  ;;  %3764 = vmatpush3.msra.mxu1 %v691_v17  ;;  %v4334_v46 = vld [vmem:[%s4331_s25] ss:$0 sm:$0xff] }
  0x2d   : > { %3765 = vmatprep.subr.mxu1 %v690_v18 }
  0x2e   : > { %3766 = vmatpush3.msra.mxu1 %v690_v18 }
  0x30   : > { %650 = vadd.xlane.f32.xlu0 %v649_v4 }
  0xb5   : > { %v648_v5 = vpop.xlane.xlu0 %647 }
  0xb6   : > { %v653_v6 = vmul.f32 0.03125, %v648_v5 }
  0xb8   : > { %v655_v7 = vsub.f32 %v641_v1, %v653_v6 }
  0xb9   : > { %v651_v8 = vpop.xlane.xlu0 %650 }
  0xba   : > { %v654_v9 = vmul.f32 0.03125, %v651_v8  ;;  %v657_v10 = vmul.f32 %v655_v7, %v655_v7 }
  0xbc   : > { %v656_v11 = vsub.f32 %v642_v2, %v654_v9  ;;  %v659_v12 = vsel %vm645_vm0, %v657_v10, 0.0 }
  0xbd   : > { %660 = vadd.xlane.f32.xlu1 %v659_v12 }
  0xbe   : > { %v658_v13 = vmul.f32 %v656_v11, %v656_v11 }
  0xc0   : > { %v662_v14 = vsel %vm645_vm0, %v658_v13, 0.0 }
  0xc1   : > { %663 = vadd.xlane.f32.xlu1 %v662_v14 }
 0x146   : > { %v661_v19 = vpop.xlane.xlu1 %660 }
 0x147   : > { %v665_v20 = vmul.f32 0.03125, %v661_v19 }
 0x149   : > { %v667_v21 = vadd.f32 1e-05, %v665_v20 }
 0x14a   : > { %v664_v22 = vpop.xlane.xlu1 %663 }
 0x14b   : > { %4000 = vrsqrt.f32 %v667_v21  ;;  %v666_v23 = vmul.f32 0.03125, %v664_v22 }
 0x14d   : > { %v668_v24 = vadd.f32 1e-05, %v666_v23 }
 0x14f   : > { %4002 = vrsqrt.f32 %v668_v24 }
 0x158   : > { %v4001_v25 = vpop.eup %4000 }
 0x159   : > { %v671_v27 = vmul.f32 %v4001_v25, %v655_v7 }
 0x15b   : > { %v679_v29 = vmul.f32 %v3521_v26, %v671_v27 }
 0x15c   : > { %v4003_v30 = vpop.eup %4002 }
 0x15d   : > { %v672_v31 = vmul.f32 %v4003_v30, %v656_v11  ;;  %v4286_v32 = vadd.f32 %v3522_v28, %v679_v29 }
 0x15f   : > { %v680_v33 = vmul.f32 %v3521_v26, %v672_v31  ;;  %3767 = vmatprep.mubr.msk.f32.mxu1 %vm645_vm0, %v4286_v32 }
 0x161   : > { %v4290_v34 = vadd.f32 %v3522_v28, %v680_v33 }
 0x163   : > { %3768 = vmatmul.mubr.msk.f32.vlgmr.msra.gmra.mxu1 %vm645_vm0, %v4290_v34 }
 0x223   : > { %v3769_v36 = vpop.f32.mrf.mxu1 }
 0x224   : > { %v4297_v37 = vadd.f32 %v3769_v36, %v3523_v35 }
 0x225   : > { %v773_v38 = vpop.f32.mrf.mxu1 }
 0x226   : > { %v4299_v39 = vadd.f32 %v3523_v35, %v773_v38  ;;  %786 = vrot.lane.b32.xlu0 %v4297_v37, %s4120_s21 }
 0x228   : > { %784 = vrot.lane.b32.xlu1 %v4299_v39, %s4120_s21  ;;  %3774 = vmatprep.mubr.msk.f32.mxu1 %vm788_vm1, %v4299_v39 }
 0x22a   : > { %994 = vrot.lane.b32.xlu0 %v4299_v39, %s4121_s1 }
 0x22c   : > { %1000 = vrot.lane.b32.xlu1 %v4297_v37, %s4122_s22 }
 0x230   : > { %998 = vrot.lane.b32.xlu1 %v4299_v39, %s4122_s22 }
 0x234   : > { %996 = vrot.lane.b32.xlu1 %v4297_v37, %s4121_s1 }
 0x298   : > { %v787_v40 = vpop.permute.xlu0 %786 }
 0x299   : > { %3770 = vmatprep.subr.msk.mxu1 %vm788_vm1, %v787_v40 }
 0x29a   : > { %3771 = vmatpush3.xpose.msk.msra.mxu1 %vm788_vm1, %v787_v40  ;;  %v785_v41 = vpop.permute.xlu1 %784 }
 0x29b   : > { %3772 = vmatprep.subr.msk.mxu1 %vm788_vm1, %v785_v41 }
 0x29c   : > { %v995_v43 = vpop.permute.xlu0 %994 }
 0x29e   : > { %3773 = vmatpush3.xpose.msk.msra.mxu1 %vm788_vm1, %v785_v41  ;;  %v1001_v42 = vpop.permute.xlu1 %1000 }
 0x29f   : > { %3784 = vmatprep.subr.msk.mxu1 %vm788_vm1, %v1001_v42 }
 0x2a1   : > { %3775 = vmatmul.mubr.msk.f32.vlgmr.msra.gmra.mxu1 %vm788_vm1, %v4297_v37 }
 0x2a2   : > { %v999_v44 = vpop.permute.xlu1 %998  ;;  %3785 = vmatpush3.xpose.msk.msra.mxu1 %vm788_vm1, %v1001_v42  ;;  %3788 = vmatprep.mubr.msk.f32.mxu1 %vm788_vm1, %v995_v43 }
 0x2a3   : > { %3786 = vmatprep.subr.msk.mxu1 %vm788_vm1, %v999_v44 }
 0x2a6   : > { %3787 = vmatpush3.xpose.msk.msra.mxu1 %vm788_vm1, %v999_v44  ;;  %v997_v45 = vpop.permute.xlu1 %996 }
 0x2a9   : > { %3789 = vmatmul.mubr.msk.f32.vlgmr.msra.gmra.mxu1 %vm788_vm1, %v997_v45 }
 0x361   : > { %v3776_v47 = vpop.f32.mrf.mxu1 }
 0x362   : > { %v873_v48 = vmul.f32 0.35355338, %v3776_v47 }
 0x363   : > { %v863_v49 = vpop.f32.mrf.mxu1 }
 0x364   : > { %v872_v50 = vmul.f32 0.35355338, %v863_v49  ;;  %v881_v51 = vadd.f32 %v4334_v46, %v873_v48 }
 0x366   : > { %v886_v52 = vsel %vm882_vm2, %v881_v51, -inf  ;;  %v880_v53 = vadd.f32 %v4334_v46, %v872_v50 }
 0x367   : > { %887 = vmax.xlane.f32.xlu1 %v886_v52 }
 0x368   : > { %v883_v54 = vsel %vm882_vm2, %v880_v53, -inf }
 0x369   : > { %v3790_v55 = vpop.f32.mrf.mxu1  ;;  %884 = vmax.xlane.f32.xlu0 %v883_v54 }
 0x36a   : > { %v1086_v57 = vmul.f32 0.35355338, %v3790_v55 }
 0x36b   : > { %v1076_v56 = vpop.f32.mrf.mxu1 }
 0x36c   : > { %v1085_v58 = vmul.f32 0.35355338, %v1076_v56  ;;  %v1088_v61 = vadd.f32 %v4334_v46, %v1086_v57 }
 0x36e   : > { %v1087_v59 = vadd.f32 %v4334_v46, %v1085_v58  ;;  %v1092_v62 = vsel %vm882_vm2, %v1088_v61, -inf }
 0x370   : > { %v1089_v60 = vsel %vm882_vm2, %v1087_v59, -inf }
 0x371   : > { %1090 = vmax.xlane.f32.xlu0 %v1089_v60 }
 0x375   : > { %1093 = vmax.xlane.f32.xlu0 %v1092_v62 }
 0x378   : > { %905 = vrot.lane.b32.xlu1 %v4299_v39, %s4123_s3 }
 0x37c   : > { %1113 = vrot.lane.b32.xlu1 %v4297_v37, %s4812_s27 }
 0x380   : > { %1111 = vrot.lane.b32.xlu1 %v4299_v39, %s4812_s27  ;;  %s4824_s27 = sld [smem:[#allocation13_spill]] }
 0x38b   : > { %907 = vrot.lane.b32.xlu0 %v4297_v37, %s4123_s3 }
 0x3f0   : > { %v888_v63 = vpop.xlane.xlu1 %887 }
 0x3f1   : > { %v890_v0 = vsub.f32 %v881_v51, %v888_v63 }
 0x3f2   : > { %v885_v1 = vpop.xlane.xlu0 %884 }
 0x3f3   : > { %v893_v2 = vmul.f32 1.442695, %v890_v0  ;;  %v889_v3 = vsub.f32 %v880_v53, %v885_v1 }
 0x3f4   : > { %v906_v10 = vpop.permute.xlu1 %905 }
 0x3f5   : > { %4004 = vpow2.f32 %v893_v2  ;;  %v891_v4 = vmul.f32 1.442695, %v889_v3 }
 0x3f7   : > { %4006 = vpow2.f32 %v891_v4 }
 0x3f8   : > { %v1114_v17 = vpop.permute.xlu1 %1113 }
 0x3fa   : > { %v1091_v5 = vpop.xlane.xlu0 %1090 }
 0x3fb   : > { %v1095_v6 = vsub.f32 %v1087_v59, %v1091_v5 }
 0x3fc   : > { %v1112_v22 = vpop.permute.xlu1 %1111 }
 0x3fd   : > { %v1097_v7 = vmul.f32 1.442695, %v1095_v6 }
 0x3fe   : > { %v1094_v8 = vpop.xlane.xlu0 %1093 }
 0x3ff   : > { %4008 = vpow2.f32 %v1097_v7  ;;  %v1096_v9 = vsub.f32 %v1088_v61, %v1094_v8 }
 0x401   : > { %v1099_v11 = vmul.f32 1.442695, %v1096_v9 }
 0x402   : > { %v4005_v12 = vpop.eup %4004  ;;  %v908_v13 = vpop.permute.xlu0 %907 }
 0x403   : > { %4010 = vpow2.f32 %v1099_v11  ;;  %3777 = vmatprep.subr.mxu0 %v908_v13  ;;  %v898_v14 = vsel %vm882_vm2, %v4005_v12, 0.0 }
 0x404   : > { %v4007_v15 = vpop.eup %4006  ;;  %899 = vadd.xlane.f32.xlu1 %v898_v14  ;;  %3778 = vmatpush3.msra.mxu0 %v908_v13 }
 0x405   : > { %3779 = vmatprep.subr.mxu0 %v906_v10  ;;  %v895_v16 = vsel %vm882_vm2, %v4007_v15, 0.0 }
 0x406   : > { %896 = vadd.xlane.f32.xlu0 %v895_v16  ;;  %3780 = vmatpush3.msra.mxu0 %v906_v10 }
 0x407   : > { %3791 = vmatprep.subr.mxu0 %v1114_v17 }
 0x40c   : > { %v4009_v18 = vpop.eup %4008 }
 0x40d   : > { %v1101_v19 = vsel %vm882_vm2, %v4009_v18, 0.0 }
 0x40e   : > { %1102 = vadd.xlane.f32.xlu0 %v1101_v19 }
 0x410   : > { %v4011_v20 = vpop.eup %4010 }
 0x411   : > { %v1104_v21 = vsel %vm882_vm2, %v4011_v20, 0.0 }
 0x412   : > { %1105 = vadd.xlane.f32.xlu1 %v1104_v21 }
 0x423   : > { %1213 = vrot.lane.b32.xlu1 %v4299_v39, %s4808_s28 }
 0x424   : > { %1215 = vrot.lane.b32.xlu0 %v4297_v37, %s4808_s28  ;;  %s4829_s28 = smov 72  }
 0x427   : > { %1211 = vrot.lane.b32.xlu1 %v4297_v37, %s4806_s4 }
 0x428   : > { %1209 = vrot.lane.b32.xlu0 %v4299_v39, %s4806_s4  ;;  %s4830_s4 = smov 104  }
 0x48d   : > { %v900_v23 = vpop.xlane.xlu1 %899 }
 0x48e   : > { %4012 = vrcp.f32 %v900_v23 }
 0x48f   : > { %v897_v24 = vpop.xlane.xlu0 %896 }
 0x490   : > { %4014 = vrcp.f32 %v897_v24 }
 0x497   : > { %v1103_v25 = vpop.xlane.xlu0 %1102 }
 0x498   : > { %4016 = vrcp.f32 %v1103_v25 }
 0x49b   : > { %v1106_v26 = vpop.xlane.xlu1 %1105  ;;  %v4013_v27 = vpop.eup %4012 }
 0x49c   : > { %4018 = vrcp.f32 %v1106_v26  ;;  %v904_v30 = vmul.f32 %v4013_v27, %v4005_v12  ;;  %v1216_v31 = vpop.permute.xlu0 %1215 }
 0x49d   : > { %v4015_v28 = vpop.eup %4014 }
 0x49e   : > { %v903_v29 = vmul.f32 %v4015_v28, %v4007_v15 }
 0x49f   : > { %v1214_v41 = vpop.permute.xlu1 %1213 }
 0x4a0   : > { %3781 = vmatprep.mubr.msk.f32.mxu0 %vm882_vm2, %v903_v29  ;;  %v1210_v40 = vpop.permute.xlu0 %1209 }
 0x4a1   : > { %3782 = vmatmul.mubr.msk.f32.vlgmr.msra.gmra.mxu0 %vm882_vm2, %v904_v30 }
 0x4a2   : > { %3792 = vmatpush3.msra.mxu0 %v1114_v17 }
 0x4a3   : > { %3793 = vmatprep.subr.mxu0 %v1112_v22  ;;  %v1212_v42 = vpop.permute.xlu1 %1211 }
 0x4a4   : > { %3794 = vmatpush3.msra.mxu0 %v1112_v22 }
 0x4a5   : > { %v4017_v33 = vpop.eup %4016  ;;  %3798 = vmatprep.subr.msk.mxu0 %vm788_vm1, %v1216_v31 }
 0x4a6   : > { %v1109_v35 = vmul.f32 %v4017_v33, %v4009_v18 }
 0x4a8   : > { %3795 = vmatprep.mubr.msk.f32.mxu0 %vm882_vm2, %v1109_v35 }
 0x4a9   : > { %v4019_v36 = vpop.eup %4018 }
 0x4aa   : > { %v1110_v38 = vmul.f32 %v4019_v36, %v4011_v20 }
 0x4ac   : > { %3796 = vmatmul.mubr.msk.f32.vlgmr.msra.gmra.mxu0 %vm882_vm2, %v1110_v38 }
 0x4ad   : > { %3799 = vmatpush3.xpose.msk.msra.mxu0 %vm788_vm1, %v1216_v31  ;;  %3802 = vmatprep.mubr.msk.f32.mxu0 %vm788_vm1, %v1210_v40 }
 0x4ae   : > { %3800 = vmatprep.subr.msk.mxu0 %vm788_vm1, %v1214_v41 }
 0x4b1   : > { %3801 = vmatpush3.xpose.msk.msra.mxu0 %vm788_vm1, %v1214_v41 }
 0x4b4   : > { %3803 = vmatmul.mubr.msk.f32.vlgmr.msra.gmra.mxu0 %vm788_vm1, %v1212_v42 }
 0x561   : > { %v3783_v43 = vpop.f32.mrf.mxu0 }
 0x562   : > { %993 = vst.msk [vmem:[#allocation2 + $0x8] sm:$0xff] %vm788_vm1, %v3783_v43 }
 0x563   : > { %v983_v44 = vpop.f32.mrf.mxu0 }
 0x564   : > { %992 = vst.msk [vmem:[#allocation2] sm:$0xff] %vm788_vm1, %v983_v44 }
 0x56c   : > { %v4376_v45 = vpop.f32.mrf.mxu0 }
 0x56e   : > { %v4378_v47 = vpop.f32.mrf.mxu0 }
 0x574   : > { %v3804_v48 = vpop.f32.mrf.mxu0 }
 0x575   : > { %v1301_v49 = vmul.f32 0.35355338, %v3804_v48 }
 0x576   : > { %v1291_v50 = vpop.f32.mrf.mxu0 }
 0x577   : > { %v1300_v51 = vmul.f32 0.35355338, %v1291_v50  ;;  %v1303_v52 = vadd.f32 %v4334_v46, %v1301_v49  ;;  %v1643_v50 = vld [vmem:[%s4780_s8 + $0x10] sm:$0xff] }
 0x579   : > { %v1307_v53 = vsel %vm882_vm2, %v1303_v52, -inf  ;;  %v1302_v54 = vadd.f32 %v4334_v46, %v1300_v51  ;;  %v1642_v51 = vld [vmem:[%s4780_s8 + $0x8] sm:$0xff] }
 0x57a   : > { %1308 = vmax.xlane.f32.xlu1 %v1307_v53 }
 0x57b   : > { %v1304_v55 = vsel %vm882_vm2, %v1302_v54, -inf }
 0x57c   : > { %1305 = vmax.xlane.f32.xlu0 %v1304_v55 }
 0x58b   : > { %1326 = vrot.lane.b32.xlu1 %v4299_v39, %s4804_s29 }
 0x58f   : > { %1430 = vrot.lane.b32.xlu1 %v4297_v37, %s4802_s30 }
 0x593   : > { %1428 = vrot.lane.b32.xlu1 %v4299_v39, %s4802_s30  ;;  %s4833_s30 = smov 16  }
 0x597   : > { %1426 = vrot.lane.b32.xlu1 %v4297_v37, %s4800_s0 }
 0x603   : > { %v1309_v56 = vpop.xlane.xlu1 %1308 }
 0x604   : > { %v1311_v57 = vsub.f32 %v1303_v52, %v1309_v56  ;;  %v1641_v52 = vld [vmem:[%s4780_s8] sm:$0xff] }
 0x605   : > { %v1306_v58 = vpop.xlane.xlu0 %1305 }
 0x606   : > { %v1314_v59 = vmul.f32 1.442695, %v1311_v57  ;;  %v1310_v60 = vsub.f32 %v1302_v54, %v1306_v58 }
 0x607   : > { %v1327_v4 = vpop.permute.xlu1 %1326 }
 0x608   : > { %4020 = vpow2.f32 %v1314_v59  ;;  %v1312_v61 = vmul.f32 1.442695, %v1310_v60  ;;  %v3551_v59 = vld [vmem:[%s4781_s9] ss:$0 sm:$0xff] }
 0x60a   : > { %4022 = vpow2.f32 %v1312_v61 }
 0x60b   : > { %v1431_v6 = vpop.permute.xlu1 %1430 }
 0x60f   : > { %v1429_v12 = vpop.permute.xlu1 %1428 }
 0x613   : > { %v1427_v13 = vpop.permute.xlu1 %1426 }
 0x615   : > { %v4021_v62 = vpop.eup %4020 }
 0x616   : > { %v1319_v63 = vsel %vm882_vm2, %v4021_v62, 0.0 }
 0x617   : > { %v4023_v0 = vpop.eup %4022  ;;  %1320 = vadd.xlane.f32.xlu0 %v1319_v63 }
 0x618   : > { %v1316_v1 = vsel %vm882_vm2, %v4023_v0, 0.0 }
 0x61b   : > { %1317 = vadd.xlane.f32.xlu0 %v1316_v1 }
 0x631   : > { %1328 = vrot.lane.b32.xlu0 %v4297_v37, %s4804_s29  ;;  %s4832_s29 = smov 8  }
 0x635   : > { %1424 = vrot.lane.b32.xlu0 %v4299_v39, %s4800_s0 }
 0x6a0   : > { %v1321_v2 = vpop.xlane.xlu0 %1320 }
 0x6a1   : > { %4024 = vrcp.f32 %v1321_v2 }
 0x6a4   : > { %v1318_v3 = vpop.xlane.xlu0 %1317 }
 0x6a5   : > { %4026 = vrcp.f32 %v1318_v3 }
 0x6a8   : > { %v1329_v5 = vpop.permute.xlu0 %1328 }
 0x6a9   : > { %3805 = vmatprep.subr.mxu1 %v1329_v5 }
 0x6aa   : > { %3806 = vmatpush3.msra.mxu1 %v1329_v5 }
 0x6ab   : > { %3807 = vmatprep.subr.mxu1 %v1327_v4 }
 0x6ac   : > { %3808 = vmatpush3.msra.mxu1 %v1327_v4  ;;  %v1425_v11 = vpop.permute.xlu0 %1424 }
 0x6ad   : > { %3812 = vmatprep.subr.msk.mxu1 %vm788_vm1, %v1431_v6 }
 0x6ae   : > { %v4025_v7 = vpop.eup %4024 }
 0x6af   : > { %v1325_v10 = vmul.f32 %v4025_v7, %v4021_v62 }
 0x6b2   : > { %v4027_v8 = vpop.eup %4026 }
 0x6b3   : > { %v1324_v9 = vmul.f32 %v4027_v8, %v4023_v0 }
 0x6b5   : > { %3809 = vmatprep.mubr.msk.f32.mxu1 %vm882_vm2, %v1324_v9 }
 0x6b6   : > { %3810 = vmatmul.mubr.msk.f32.vlgmr.msra.gmra.mxu1 %vm882_vm2, %v1325_v10 }
 0x6b7   : > { %3813 = vmatpush3.xpose.msk.msra.mxu1 %vm788_vm1, %v1431_v6  ;;  %3816 = vmatprep.mubr.msk.f32.mxu1 %vm788_vm1, %v1425_v11 }
 0x6b8   : > { %3814 = vmatprep.subr.msk.mxu1 %vm788_vm1, %v1429_v12 }
 0x6bb   : > { %3815 = vmatpush3.xpose.msk.msra.mxu1 %vm788_vm1, %v1429_v12 }
 0x6be   : > { %3817 = vmatmul.mubr.msk.f32.vlgmr.msra.gmra.mxu1 %vm788_vm1, %v1427_v13  ;;  %v1781_v13 = vld [vmem:[%s4784_s12 + $0x10] sm:$0xff] }
 0x776   : > { %v3811_v14 = vpop.f32.mrf.mxu1 }
 0x778   : > { %v1404_v15 = vpop.f32.mrf.mxu1 }
 0x77e   : > { %v3818_v16 = vpop.f32.mrf.mxu1 }
 0x77f   : > { %v1516_v17 = vmul.f32 0.35355338, %v3818_v16 }
 0x780   : > { %v1506_v18 = vpop.f32.mrf.mxu1 }
 0x781   : > { %v1515_v19 = vmul.f32 0.35355338, %v1506_v18  ;;  %v1518_v20 = vadd.f32 %v4334_v46, %v1516_v17 }
 0x783   : > { %v1522_v21 = vsel %vm882_vm2, %v1518_v20, -inf  ;;  %v1517_v22 = vadd.f32 %v4334_v46, %v1515_v19 }
 0x784   : > { %1523 = vmax.xlane.f32.xlu1 %v1522_v21 }
 0x785   : > { %v1519_v23 = vsel %vm882_vm2, %v1517_v22, -inf }
 0x786   : > { %1520 = vmax.xlane.f32.xlu0 %v1519_v23  ;;  %v3554_v23 = vld [vmem:[%s4782_s10] ss:$0 sm:$0xff] }
 0x795   : > { %1541 = vrot.lane.b32.xlu1 %v4299_v39, %s4798_s23 }
 0x799   : > { %1200 = vrot.lane.b32.xlu1 %v4378_v47, %s4796_s24 }
 0x79d   : > { %1202 = vrot.lane.b32.xlu1 %v4376_v45, %s4796_s24  ;;  %s4810_s24 = smov 24  }
 0x7a1   : > { %1417 = vrot.lane.b32.xlu1 %v3811_v14, %s4794_s2  ;;  %v1780_v14 = vld [vmem:[%s4784_s12 + $0x8] sm:$0xff] }
 0x80d   : > { %v1524_v24 = vpop.xlane.xlu1 %1523 }
 0x80e   : > { %v1526_v25 = vsub.f32 %v1518_v20, %v1524_v24 }
 0x80f   : > { %v1521_v26 = vpop.xlane.xlu0 %1520 }
 0x810   : > { %v1529_v27 = vmul.f32 1.442695, %v1526_v25  ;;  %v1525_v28 = vsub.f32 %v1517_v22, %v1521_v26  ;;  %v3555_v25 = vld [vmem:[%s4783_s11] ss:$0 sm:$0xff] }
 0x811   : > { %v1542_v29 = vpop.permute.xlu1 %1541 }
 0x812   : > { %4028 = vpow2.f32 %v1529_v27  ;;  %v1527_v30 = vmul.f32 1.442695, %v1525_v28 }
 0x814   : > { %4030 = vpow2.f32 %v1527_v30 }
 0x815   : > { %v1201_v39 = vpop.permute.xlu1 %1200 }
 0x816   : > { %1207 = vst.msk [vmem:[#allocation2] sm:$0xff] %vm1206_vm3, %v1201_v39 }
 0x819   : > { %v1203_v31 = vpop.permute.xlu1 %1202 }
 0x81a   : > { %1208 = vst.msk [vmem:[#allocation2 + $0x8] sm:$0xff] %vm1206_vm3, %v1203_v31  ;;  %v1896_v31 = vld [vmem:[%s4786_s14 + $0x38] sm:$0xff] }
 0x81d   : > { %v1418_v33 = vpop.permute.xlu1 %1417 }
 0x81e   : > { %1423 = vst.msk [vmem:[#allocation2 + $0x8] sm:$0xff] %vm1421_vm4, %v1418_v33  ;;  %v1895_v33 = vld [vmem:[%s4786_s14 + $0x30] sm:$0xff] }
 0x81f   : > { %v4029_v35 = vpop.eup %4028 }
 0x820   : > { %v1534_v36 = vsel %vm882_vm2, %v4029_v35, 0.0 }
 0x821   : > { %v4031_v38 = vpop.eup %4030  ;;  %1535 = vadd.xlane.f32.xlu0 %v1534_v36  ;;  %v1893_v36 = vld [vmem:[%s4786_s14 + $0x20] sm:$0xff] }
 0x822   : > { %v1531_v40 = vsel %vm882_vm2, %v4031_v38, 0.0 }
 0x825   : > { %1532 = vadd.xlane.f32.xlu0 %v1531_v40  ;;  %v1891_v40 = vld [vmem:[%s4786_s14 + $0x10] sm:$0xff] }
 0x83b   : > { %1543 = vrot.lane.b32.xlu0 %v4297_v37, %s4798_s23  ;;  %v1644_v37 = vld [vmem:[%s4780_s8 + $0x18] sm:$0xff] }
 0x83f   : > { %1415 = vrot.lane.b32.xlu0 %v1404_v15, %s4794_s2  ;;  %v1779_v15 = vld [vmem:[%s4784_s12] sm:$0xff] }
 0x8aa   : > { %v1536_v41 = vpop.xlane.xlu0 %1535 }
 0x8ab   : > { %4032 = vrcp.f32 %v1536_v41  ;;  %v1890_v41 = vld [vmem:[%s4786_s14 + $0x8] sm:$0xff] }
 0x8ae   : > { %v1533_v42 = vpop.xlane.xlu0 %1532 }
 0x8af   : > { %4034 = vrcp.f32 %v1533_v42  ;;  %v1889_v42 = vld [vmem:[%s4786_s14] sm:$0xff] }
 0x8b2   : > { %v1544_v43 = vpop.permute.xlu0 %1543 }
 0x8b3   : > { %3819 = vmatprep.subr.mxu0 %v1544_v43 }
 0x8b4   : > { %3820 = vmatpush3.msra.mxu0 %v1544_v43  ;;  %v3556_v43 = vld [vmem:[%s4824_s27] ss:$0 sm:$0xff] }
 0x8b5   : > { %3821 = vmatprep.subr.mxu0 %v1542_v29 }
 0x8b6   : > { %3822 = vmatpush3.msra.mxu0 %v1542_v29  ;;  %v1416_v44 = vpop.permute.xlu0 %1415 }
 0x8b7   : > { %1422 = vst.msk [vmem:[#allocation2] sm:$0xff] %vm1421_vm4, %v1416_v44  ;;  %3826 = vmatprep.subr.mxu0 %v1644_v37 }
 0x8b8   : > { %v4033_v45 = vpop.eup %4032 }
 0x8b9   : > { %v1540_v49 = vmul.f32 %v4033_v45, %v4029_v35  ;;  %v1894_v35 = vld [vmem:[%s4786_s14 + $0x28] sm:$0xff] }
 0x8bc   : > { %v4035_v47 = vpop.eup %4034 }
 0x8bd   : > { %v1539_v48 = vmul.f32 %v4035_v47, %v4031_v38  ;;  %v1892_v38 = vld [vmem:[%s4786_s14 + $0x18] sm:$0xff] }
 0x8bf   : > { %3823 = vmatprep.mubr.msk.f32.mxu0 %vm882_vm2, %v1539_v48 }
 0x8c0   : > { %3824 = vmatmul.mubr.msk.f32.vlgmr.msra.gmra.mxu0 %vm882_vm2, %v1540_v49 }
 0x8c1   : > { %3827 = vmatpush3.msra.mxu0 %v1644_v37 }
 0x8c2   : > { %3828 = vmatprep.subr.mxu0 %v1643_v50 }
 0x8c3   : > { %3829 = vmatpush3.msra.mxu0 %v1643_v50 }
 0x8c4   : > { %3830 = vmatprep.subr.mxu0 %v1642_v51 }
 0x8c5   : > { %3831 = vmatpush3.msra.mxu0 %v1642_v51 }
 0x8c6   : > { %3832 = vmatprep.subr.mxu0 %v1641_v52 }
 0x8c7   : > { %3833 = vmatpush3.msra.mxu0 %v1641_v52 }
 0x8c8   : > { %3848 = vmatprep.subr.mxu0 %v1896_v31 }
 0x980   : > { %v3825_v53 = vpop.f32.mrf.mxu0 }
 0x981   : > { %1632 = vrot.lane.b32.xlu1 %v3825_v53, %s4810_s24 }
 0x982   : > { %v1619_v54 = vpop.f32.mrf.mxu0 }
 0x983   : > { %1630 = vrot.lane.b32.xlu0 %v1619_v54, %s4810_s24 }
 0x9f3   : > { %v1633_v55 = vpop.permute.xlu1 %1632 }
 0x9f4   : > { %1638 = vst.msk [vmem:[#allocation2 + $0x8] sm:$0xff] %vm1636_vm5, %v1633_v55 }
 0x9f5   : > { %v1631_v56 = vpop.permute.xlu0 %1630 }
 0x9f6   : > { %1637 = vst.msk [vmem:[#allocation2] sm:$0xff] %vm1636_vm5, %v1631_v56 }
 0x9fb   : > { %v1640_v58 = vld [vmem:[#allocation2 + $0x8] sm:$0xff] }
 0x9fd   : > { %v1639_v57 = vld [vmem:[#allocation2] sm:$0xff] }
 0x9fe   : > { %3834 = vmatprep.mubr.msk.f32.mxu0 %vm645_vm0, %v1639_v57 }
 0x9ff   : > { %3835 = vmatmul.mubr.msk.f32.vlgmr.msra.gmra.mxu0 %vm645_vm0, %v1640_v58 }
 0xa00   : > { %3849 = vmatpush3.msra.mxu0 %v1896_v31 }
 0xa01   : > { %3850 = vmatprep.subr.mxu0 %v1895_v33 }
 0xa02   : > { %3851 = vmatpush3.msra.mxu0 %v1895_v33 }
 0xa03   : > { %3852 = vmatprep.subr.mxu0 %v1894_v35 }
 0xa04   : > { %3853 = vmatpush3.msra.mxu0 %v1894_v35 }
 0xa05   : > { %3854 = vmatprep.subr.mxu0 %v1893_v36 }
 0xa06   : > { %3855 = vmatpush3.msra.mxu0 %v1893_v36  ;;  %v3563_v36 = vld [vmem:[%s4789_s17] ss:$0 sm:$0xff] }
 0xa07   : > { %3856 = vmatprep.subr.mxu0 %v1892_v38 }
 0xa08   : > { %3857 = vmatpush3.msra.mxu0 %v1892_v38 }
 0xa09   : > { %3858 = vmatprep.subr.mxu0 %v1891_v40 }
 0xa0a   : > { %3859 = vmatpush3.msra.mxu0 %v1891_v40 }
 0xa0b   : > { %3860 = vmatprep.subr.mxu0 %v1890_v41 }
 0xa0c   : > { %3861 = vmatpush3.msra.mxu0 %v1890_v41 }
 0xa0d   : > { %3862 = vmatprep.subr.mxu0 %v1889_v42 }
 0xa0e   : > { %3863 = vmatpush3.msra.mxu0 %v1889_v42  ;;  %v3569_v42 = vld [vmem:[%s4779_s7 + $0x1] ss:$0 sm:$0xff] }
 0xabf   : > { %v3836_v60 = vpop.f32.mrf.mxu0 }
 0xac0   : > { %v1730_v61 = vadd.f32 %v3836_v60, %v3551_v59 }
 0xac1   : > { %v1724_v62 = vpop.f32.mrf.mxu0 }
 0xac2   : > { %v1725_v63 = vadd.f32 %v3551_v59, %v1724_v62  ;;  %v1734_v0 = vadd.f32 %v1730_v61, %v4290_v34 }
 0xac4   : > { %v1740_v1 = vsel %vm645_vm0, %v1734_v0, 0.0  ;;  %v1733_v2 = vadd.f32 %v1725_v63, %v4286_v32  ;;  %v1782_v32 = vld [vmem:[%s4784_s12 + $0x18] sm:$0xff] }
 0xac5   : > { %1741 = vadd.xlane.f32.xlu1 %v1740_v1  ;;  %3837 = vmatprep.subr.mxu1 %v1782_v32 }
 0xac6   : > { %v1737_v3 = vsel %vm645_vm0, %v1733_v2, 0.0  ;;  %3838 = vmatpush3.msra.mxu1 %v1782_v32 }
 0xac7   : > { %1738 = vadd.xlane.f32.xlu0 %v1737_v3  ;;  %3839 = vmatprep.subr.mxu1 %v1781_v13 }
 0xac8   : > { %3840 = vmatpush3.msra.mxu1 %v1781_v13 }
 0xac9   : > { %3841 = vmatprep.subr.mxu1 %v1780_v14 }
 0xaca   : > { %3842 = vmatpush3.msra.mxu1 %v1780_v14 }
 0xacb   : > { %3843 = vmatprep.subr.mxu1 %v1779_v15 }
 0xacc   : > { %3844 = vmatpush3.msra.mxu1 %v1779_v15 }
 0xb4e   : > { %v1742_v4 = vpop.xlane.xlu1 %1741 }
 0xb4f   : > { %v1744_v5 = vmul.f32 0.03125, %v1742_v4 }
 0xb50   : > { %v1739_v6 = vpop.xlane.xlu0 %1738 }
 0xb51   : > { %v1743_v7 = vmul.f32 0.03125, %v1739_v6  ;;  %v1746_v8 = vsub.f32 %v1734_v0, %v1744_v5 }
 0xb53   : > { %v1745_v9 = vsub.f32 %v1733_v2, %v1743_v7  ;;  %v1748_v12 = vmul.f32 %v1746_v8, %v1746_v8  ;;  %v3559_v2 = vld [vmem:[%s4787_s15] ss:$0 sm:$0xff] }
 0xb55   : > { %v1747_v10 = vmul.f32 %v1745_v9, %v1745_v9  ;;  %v1752_v34 = vsel %vm645_vm0, %v1748_v12, 0.0 }
 0xb57   : > { %v1749_v11 = vsel %vm645_vm0, %v1747_v10, 0.0 }
 0xb58   : > { %1750 = vadd.xlane.f32.xlu0 %v1749_v11 }
 0xb5c   : > { %1753 = vadd.xlane.f32.xlu0 %v1752_v34 }
 0xbe1   : > { %v1751_v16 = vpop.xlane.xlu0 %1750 }
 0xbe2   : > { %v1755_v17 = vmul.f32 0.03125, %v1751_v16 }
 0xbe4   : > { %v1757_v18 = vadd.f32 1e-05, %v1755_v17 }
 0xbe5   : > { %v1754_v19 = vpop.xlane.xlu0 %1753 }
 0xbe6   : > { %4036 = vrsqrt.f32 %v1757_v18  ;;  %v1756_v20 = vmul.f32 0.03125, %v1754_v19  ;;  %v3567_v19 = vld [vmem:[%s4778_s6 + $0x38] sm:$0xff] }
 0xbe7   : > { %3867 = vmatprep.subr.mxu1 %v3567_v19 }
 0xbe8   : > { %v1758_v21 = vadd.f32 1e-05, %v1756_v20  ;;  %v3566_v20 = vld [vmem:[%s4778_s6 + $0x30] sm:$0xff] }
 0xbea   : > { %4038 = vrsqrt.f32 %v1758_v21  ;;  %v3565_v21 = vld [vmem:[%s4778_s6 + $0x28] sm:$0xff] }
 0xbf3   : > { %v4037_v22 = vpop.eup %4036 }
 0xbf4   : > { %v1761_v24 = vmul.f32 %v4037_v22, %v1745_v9  ;;  %v3564_v22 = vld [vmem:[%s4778_s6 + $0x20] sm:$0xff] }
 0xbf6   : > { %v1769_v26 = vmul.f32 %v3554_v23, %v1761_v24 }
 0xbf7   : > { %v4039_v27 = vpop.eup %4038 }
 0xbf8   : > { %v1762_v28 = vmul.f32 %v4039_v27, %v1746_v8  ;;  %v4473_v29 = vadd.f32 %v3555_v25, %v1769_v26 }
 0xbfa   : > { %v1770_v30 = vmul.f32 %v3554_v23, %v1762_v28  ;;  %3845 = vmatprep.mubr.msk.f32.mxu1 %vm645_vm0, %v4473_v29 }
 0xbfc   : > { %v1778_v39 = vadd.f32 %v3555_v25, %v1770_v30  ;;  %v3562_v30 = vld [vmem:[%s4788_s16] ss:$0 sm:$0xff] }
 0xbfe   : > { %3846 = vmatmul.mubr.msk.f32.vlgmr.msra.gmra.mxu1 %vm645_vm0, %v1778_v39 }
 0xbff   : > { %3868 = vmatpush3.msra.mxu1 %v3567_v19 }
 0xc00   : > { %3869 = vmatprep.subr.mxu1 %v3566_v20 }
 0xc01   : > { %3870 = vmatpush3.msra.mxu1 %v3566_v20 }
 0xc02   : > { %3871 = vmatprep.subr.mxu1 %v3565_v21 }
 0xc03   : > { %3872 = vmatpush3.msra.mxu1 %v3565_v21 }
 0xc04   : > { %3873 = vmatprep.subr.mxu1 %v3564_v22 }
 0xc05   : > { %3874 = vmatpush3.msra.mxu1 %v3564_v22 }
 0xcbe   : > { %v3847_v44 = vpop.f32.mrf.mxu1 }
 0xcbf   : > { %v1868_v45 = vadd.f32 %v3847_v44, %v3556_v43 }
 0xcc0   : > { %v1862_v47 = vpop.f32.mrf.mxu1 }
 0xcc1   : > { %v1872_v48 = vmul.f32 %v1868_v45, %v1868_v45  ;;  %v1863_v49 = vadd.f32 %v3556_v43, %v1862_v47 }
 0xcc3   : > { %v1874_v37 = vmul.f32 %v1872_v48, %v1868_v45  ;;  %v1871_v50 = vmul.f32 %v1863_v49, %v1863_v49 }
 0xcc5   : > { %v1876_v51 = vmul.f32 0.044715, %v1874_v37  ;;  %v1873_v52 = vmul.f32 %v1871_v50, %v1863_v49 }
 0xcc7   : > { %v1878_v53 = vadd.f32 %v1876_v51, %v1868_v45  ;;  %v1875_v54 = vmul.f32 0.044715, %v1873_v52 }
 0xcc9   : > { %v1880_v55 = vmul.f32 0.7978846, %v1878_v53  ;;  %v1877_v56 = vadd.f32 %v1875_v54, %v1863_v49 }
 0xccb   : > { %4040 = vtanh.f32 %v1880_v55  ;;  %v1879_v57 = vmul.f32 0.7978846, %v1877_v56 }
 0xccd   : > { %4042 = vtanh.f32 %v1879_v57 }
 0xcd8   : > { %v4041_v58 = vpop.eup %4040 }
 0xcd9   : > { %v1884_v59 = vadd.f32 1.0, %v4041_v58 }
 0xcda   : > { %v4043_v60 = vpop.eup %4042 }
 0xcdb   : > { %v1883_v61 = vadd.f32 1.0, %v4043_v60  ;;  %v1886_v62 = vmul.f32 0.5, %v1884_v59 }
 0xcdd   : > { %v1885_v63 = vmul.f32 0.5, %v1883_v61  ;;  %v1888_v1 = vmul.f32 %v1886_v62, %v1868_v45 }
 0xcdf   : > { %v1887_v0 = vmul.f32 %v1885_v63, %v1863_v49 }
 0xce1   : > { %3864 = vmatprep.mubr.msk.f32.mxu0 %vm1904_vm6, %v1887_v0 }
 0xce2   : > { %3865 = vmatmul.mubr.msk.f32.vlgmr.msra.gmra.mxu0 %vm1904_vm6, %v1888_v1 }
 0xda2   : > { %v3866_v3 = vpop.f32.mrf.mxu0 }
 0xda3   : > { %v1983_v4 = vadd.f32 %v3866_v3, %v3559_v2 }
 0xda4   : > { %v1977_v5 = vpop.f32.mrf.mxu0 }
 0xda5   : > { %v1978_v6 = vadd.f32 %v3559_v2, %v1977_v5  ;;  %v1987_v7 = vadd.f32 %v1983_v4, %v1778_v39 }
 0xda7   : > { %v1993_v8 = vsel %vm645_vm0, %v1987_v7, 0.0  ;;  %v1986_v9 = vadd.f32 %v1978_v6, %v4473_v29 }
 0xda8   : > { %1994 = vadd.xlane.f32.xlu1 %v1993_v8 }
 0xda9   : > { %v1990_v10 = vsel %vm645_vm0, %v1986_v9, 0.0 }
 0xdaa   : > { %1991 = vadd.xlane.f32.xlu0 %v1990_v10 }
 0xe31   : > { %v1995_v11 = vpop.xlane.xlu1 %1994 }
 0xe32   : > { %v1997_v12 = vmul.f32 0.03125, %v1995_v11 }
 0xe33   : > { %v1992_v34 = vpop.xlane.xlu0 %1991 }
 0xe34   : > { %v1999_v32 = vsub.f32 %v1987_v7, %v1997_v12  ;;  %v1996_v13 = vmul.f32 0.03125, %v1992_v34 }
 0xe36   : > { %v1998_v14 = vsub.f32 %v1986_v9, %v1996_v13  ;;  %v2001_v15 = vmul.f32 %v1999_v32, %v1999_v32 }
 0xe38   : > { %v2005_v16 = vsel %vm645_vm0, %v2001_v15, 0.0  ;;  %v2000_v17 = vmul.f32 %v1998_v14, %v1998_v14 }
 0xe39   : > { %2006 = vadd.xlane.f32.xlu1 %v2005_v16 }
 0xe3a   : > { %v2002_v18 = vsel %vm645_vm0, %v2000_v17, 0.0 }
 0xe3b   : > { %2003 = vadd.xlane.f32.xlu0 %v2002_v18 }
 0xec2   : > { %v2007_v23 = vpop.xlane.xlu1 %2006 }
 0xec3   : > { %v2009_v24 = vmul.f32 0.03125, %v2007_v23 }
 0xec4   : > { %v2004_v25 = vpop.xlane.xlu0 %2003 }
 0xec5   : > { %v2011_v26 = vadd.f32 1e-05, %v2009_v24  ;;  %v2008_v27 = vmul.f32 0.03125, %v2004_v25 }
 0xec7   : > { %4044 = vrsqrt.f32 %v2011_v26  ;;  %v2010_v28 = vadd.f32 1e-05, %v2008_v27 }
 0xec9   : > { %4046 = vrsqrt.f32 %v2010_v28 }
 0xed4   : > { %v4045_v29 = vpop.eup %4044 }
 0xed5   : > { %v2015_v39 = vmul.f32 %v4045_v29, %v1999_v32 }
 0xed6   : > { %v4047_v31 = vpop.eup %4046 }
 0xed7   : > { %v2014_v33 = vmul.f32 %v4047_v31, %v1998_v14  ;;  %v2023_v35 = vmul.f32 %v3562_v30, %v2015_v39 }
 0xed9   : > { %v2022_v38 = vmul.f32 %v3562_v30, %v2014_v33  ;;  %v4535_v41 = vadd.f32 %v3563_v36, %v2023_v35 }
 0xedb   : > { %v4533_v40 = vadd.f32 %v3563_v36, %v2022_v38 }
 0xedd   : > { %3875 = vmatprep.mubr.msk.f32.mxu1 %vm645_vm0, %v4533_v40 }
 0xede   : > { %3876 = vmatmul.mubr.msk.f32.vlgmr.msra.gmra.mxu1 %vm645_vm0, %v4535_v41 }
 0xf9e   : > { %v3877_v43 = vpop.f32.mrf.mxu1 }
 0xf9f   : > { %v4544_v44 = vadd.f32 %v3877_v43, %v3569_v42 }
 0xfa0   : > { %v2117_v45 = vpop.f32.mrf.mxu1 }
 0xfa1   : > { %v4546_v47 = vadd.f32 %v3569_v42, %v2117_v45  ;;  %2130 = vrot.lane.b32.xlu0 %v4544_v44, %s4120_s21 }
 0xfa3   : > { %2128 = vrot.lane.b32.xlu1 %v4546_v47, %s4120_s21  ;;  %3882 = vmatprep.mubr.msk.f32.mxu1 %vm788_vm1, %v4546_v47  ;;  %s4825_s21 = smov 56  }
 0xfa5   : > { %2330 = vrot.lane.b32.xlu0 %v4546_v47, %s4121_s1 }
 0xfa7   : > { %2336 = vrot.lane.b32.xlu1 %v4544_v44, %s4122_s22 }
 0xfab   : > { %2334 = vrot.lane.b32.xlu1 %v4546_v47, %s4122_s22  ;;  %s4827_s22 = smov 112  }
 0xfaf   : > { %2332 = vrot.lane.b32.xlu1 %v4544_v44, %s4121_s1  ;;  %s4826_s1 = smov 80  }
0x1013   : > { %v2131_v48 = vpop.permute.xlu0 %2130 }
0x1014   : > { %3878 = vmatprep.subr.msk.mxu1 %vm788_vm1, %v2131_v48 }
0x1015   : > { %3879 = vmatpush3.xpose.msk.msra.mxu1 %vm788_vm1, %v2131_v48  ;;  %v2129_v49 = vpop.permute.xlu1 %2128 }
0x1016   : > { %3880 = vmatprep.subr.msk.mxu1 %vm788_vm1, %v2129_v49 }
0x1017   : > { %v2331_v50 = vpop.permute.xlu0 %2330 }
0x1019   : > { %3881 = vmatpush3.xpose.msk.msra.mxu1 %vm788_vm1, %v2129_v49  ;;  %v2337_v37 = vpop.permute.xlu1 %2336 }
0x101a   : > { %3892 = vmatprep.subr.msk.mxu1 %vm788_vm1, %v2337_v37 }
0x101c   : > { %3883 = vmatmul.mubr.msk.f32.vlgmr.msra.gmra.mxu1 %vm788_vm1, %v4544_v44 }
0x101d   : > { %v2335_v51 = vpop.permute.xlu1 %2334  ;;  %3893 = vmatpush3.xpose.msk.msra.mxu1 %vm788_vm1, %v2337_v37  ;;  %3896 = vmatprep.mubr.msk.f32.mxu1 %vm788_vm1, %v2331_v50 }
0x101e   : > { %3894 = vmatprep.subr.msk.mxu1 %vm788_vm1, %v2335_v51 }
0x1021   : > { %3895 = vmatpush3.xpose.msk.msra.mxu1 %vm788_vm1, %v2335_v51  ;;  %v2333_v52 = vpop.permute.xlu1 %2332 }
0x1024   : > { %3897 = vmatmul.mubr.msk.f32.vlgmr.msra.gmra.mxu1 %vm788_vm1, %v2333_v52 }
0x10dc   : > { %v3884_v53 = vpop.f32.mrf.mxu1 }
0x10dd   : > { %v2216_v54 = vmul.f32 0.35355338, %v3884_v53 }
0x10de   : > { %v2206_v55 = vpop.f32.mrf.mxu1 }
0x10df   : > { %v2215_v56 = vmul.f32 0.35355338, %v2206_v55  ;;  %v2218_v57 = vadd.f32 %v4334_v46, %v2216_v54 }
0x10e1   : > { %v2222_v58 = vsel %vm882_vm2, %v2218_v57, -inf  ;;  %v2217_v59 = vadd.f32 %v4334_v46, %v2215_v56 }
0x10e2   : > { %2223 = vmax.xlane.f32.xlu1 %v2222_v58 }
0x10e3   : > { %v2219_v60 = vsel %vm882_vm2, %v2217_v59, -inf }
0x10e4   : > { %v3898_v61 = vpop.f32.mrf.mxu1  ;;  %2220 = vmax.xlane.f32.xlu0 %v2219_v60 }
0x10e5   : > { %v2422_v63 = vmul.f32 0.35355338, %v3898_v61 }
0x10e6   : > { %v2412_v62 = vpop.f32.mrf.mxu1 }
0x10e7   : > { %v2421_v0 = vmul.f32 0.35355338, %v2412_v62  ;;  %v2424_v3 = vadd.f32 %v4334_v46, %v2422_v63 }
0x10e9   : > { %v2423_v1 = vadd.f32 %v4334_v46, %v2421_v0  ;;  %v2428_v4 = vsel %vm882_vm2, %v2424_v3, -inf }
0x10eb   : > { %v2425_v2 = vsel %vm882_vm2, %v2423_v1, -inf }
0x10ec   : > { %2426 = vmax.xlane.f32.xlu0 %v2425_v2 }
0x10f0   : > { %2429 = vmax.xlane.f32.xlu0 %v2428_v4 }
0x10f3   : > { %2241 = vrot.lane.b32.xlu1 %v4546_v47, %s4123_s3 }
0x10f7   : > { %2449 = vrot.lane.b32.xlu1 %v4544_v44, %s4825_s21 }
0x10fb   : > { %2447 = vrot.lane.b32.xlu1 %v4546_v47, %s4825_s21  ;;  %s3519_s21 = sshll.u32 %s4258_s13, 2 }
0x1106   : > { %2243 = vrot.lane.b32.xlu0 %v4544_v44, %s4123_s3  ;;  %s4828_s3 = smov 48  }
0x116b   : > { %v2224_v5 = vpop.xlane.xlu1 %2223 }
0x116c   : > { %v2226_v6 = vsub.f32 %v2218_v57, %v2224_v5  ;;  %v4096_v57 = vld [vmem:[%s4331_s25] ss:$0 sm:$0xff]  ;;  %s4831_s25 = smov 40  }
0x116d   : > { %v2221_v7 = vpop.xlane.xlu0 %2220 }
0x116e   : > { %v2229_v46 = vmul.f32 1.442695, %v2226_v6  ;;  %v2225_v8 = vsub.f32 %v2217_v59, %v2221_v7 }
0x116f   : > { %v2242_v13 = vpop.permute.xlu1 %2241 }
0x1170   : > { %4048 = vpow2.f32 %v2229_v46  ;;  %v2227_v9 = vmul.f32 1.442695, %v2225_v8 }
0x1172   : > { %4050 = vpow2.f32 %v2227_v9 }
0x1173   : > { %v2450_v20 = vpop.permute.xlu1 %2449 }
0x1175   : > { %v2427_v10 = vpop.xlane.xlu0 %2426 }
0x1176   : > { %v2431_v11 = vsub.f32 %v2423_v1, %v2427_v10 }
0x1177   : > { %v2448_v25 = vpop.permute.xlu1 %2447 }
0x1178   : > { %v2433_v12 = vmul.f32 1.442695, %v2431_v11 }
0x1179   : > { %v2430_v34 = vpop.xlane.xlu0 %2429 }
0x117a   : > { %4052 = vpow2.f32 %v2433_v12  ;;  %v2432_v32 = vsub.f32 %v2424_v3, %v2430_v34 }
0x117c   : > { %v2435_v14 = vmul.f32 1.442695, %v2432_v32 }
0x117d   : > { %v4049_v15 = vpop.eup %4048  ;;  %v2244_v16 = vpop.permute.xlu0 %2243 }
0x117e   : > { %4054 = vpow2.f32 %v2435_v14  ;;  %3885 = vmatprep.subr.mxu0 %v2244_v16  ;;  %v2234_v17 = vsel %vm882_vm2, %v4049_v15, 0.0 }
0x117f   : > { %v4051_v18 = vpop.eup %4050  ;;  %2235 = vadd.xlane.f32.xlu1 %v2234_v17  ;;  %3886 = vmatpush3.msra.mxu0 %v2244_v16 }
0x1180   : > { %3887 = vmatprep.subr.mxu0 %v2242_v13  ;;  %v2231_v19 = vsel %vm882_vm2, %v4051_v18, 0.0 }
0x1181   : > { %2232 = vadd.xlane.f32.xlu0 %v2231_v19  ;;  %3888 = vmatpush3.msra.mxu0 %v2242_v13 }
0x1182   : > { %3899 = vmatprep.subr.mxu0 %v2450_v20 }
0x1187   : > { %v4053_v21 = vpop.eup %4052 }
0x1188   : > { %v2437_v22 = vsel %vm882_vm2, %v4053_v21, 0.0 }
0x1189   : > { %2438 = vadd.xlane.f32.xlu0 %v2437_v22 }
0x118b   : > { %v4055_v23 = vpop.eup %4054 }
0x118c   : > { %v2440_v24 = vsel %vm882_vm2, %v4055_v23, 0.0 }
0x118d   : > { %2441 = vadd.xlane.f32.xlu1 %v2440_v24 }
0x119e   : > { %2548 = vrot.lane.b32.xlu1 %v4546_v47, %s4826_s1 }
0x119f   : > { %2550 = vrot.lane.b32.xlu0 %v4544_v44, %s4826_s1 }
0x11a2   : > { %2546 = vrot.lane.b32.xlu1 %v4544_v44, %s4827_s22 }
0x11a3   : > { %2544 = vrot.lane.b32.xlu0 %v4546_v47, %s4827_s22 }
0x1208   : > { %v2236_v26 = vpop.xlane.xlu1 %2235 }
0x1209   : > { %4056 = vrcp.f32 %v2236_v26 }
0x120a   : > { %v2233_v27 = vpop.xlane.xlu0 %2232 }
0x120b   : > { %4058 = vrcp.f32 %v2233_v27 }
0x1212   : > { %v2439_v28 = vpop.xlane.xlu0 %2438 }
0x1213   : > { %4060 = vrcp.f32 %v2439_v28 }
0x1216   : > { %v2442_v29 = vpop.xlane.xlu1 %2441  ;;  %v4057_v30 = vpop.eup %4056 }
0x1217   : > { %4062 = vrcp.f32 %v2442_v29  ;;  %v2240_v33 = vmul.f32 %v4057_v30, %v4049_v15  ;;  %v2551_v35 = vpop.permute.xlu0 %2550 }
0x1218   : > { %v4059_v39 = vpop.eup %4058 }
0x1219   : > { %v2239_v31 = vmul.f32 %v4059_v39, %v4051_v18 }
0x121a   : > { %v2549_v48 = vpop.permute.xlu1 %2548 }
0x121b   : > { %3889 = vmatprep.mubr.msk.f32.mxu0 %vm882_vm2, %v2239_v31  ;;  %v2545_v45 = vpop.permute.xlu0 %2544 }
0x121c   : > { %3890 = vmatmul.mubr.msk.f32.vlgmr.msra.gmra.mxu0 %vm882_vm2, %v2240_v33 }
0x121d   : > { %3900 = vmatpush3.msra.mxu0 %v2450_v20 }
0x121e   : > { %3901 = vmatprep.subr.mxu0 %v2448_v25  ;;  %v2547_v49 = vpop.permute.xlu1 %2546 }
0x121f   : > { %3902 = vmatpush3.msra.mxu0 %v2448_v25 }
0x1220   : > { %v4061_v36 = vpop.eup %4060  ;;  %3906 = vmatprep.subr.msk.mxu0 %vm788_vm1, %v2551_v35 }
0x1221   : > { %v2445_v38 = vmul.f32 %v4061_v36, %v4053_v21 }
0x1223   : > { %3903 = vmatprep.mubr.msk.f32.mxu0 %vm882_vm2, %v2445_v38 }
0x1224   : > { %v4063_v42 = vpop.eup %4062 }
0x1225   : > { %v2446_v43 = vmul.f32 %v4063_v42, %v4055_v23 }
0x1227   : > { %3904 = vmatmul.mubr.msk.f32.vlgmr.msra.gmra.mxu0 %vm882_vm2, %v2446_v43 }
0x1228   : > { %3907 = vmatpush3.xpose.msk.msra.mxu0 %vm788_vm1, %v2551_v35  ;;  %3910 = vmatprep.mubr.msk.f32.mxu0 %vm788_vm1, %v2545_v45 }
0x1229   : > { %3908 = vmatprep.subr.msk.mxu0 %vm788_vm1, %v2549_v48 }
0x122c   : > { %3909 = vmatpush3.xpose.msk.msra.mxu0 %vm788_vm1, %v2549_v48 }
0x122f   : > { %3911 = vmatmul.mubr.msk.f32.vlgmr.msra.gmra.mxu0 %vm788_vm1, %v2547_v49 }
0x12dc   : > { %v3891_v37 = vpop.f32.mrf.mxu0 }
0x12dd   : > { %2329 = vst.msk [vmem:[#allocation2 + $0x8] sm:$0xff] %vm788_vm1, %v3891_v37 }
0x12de   : > { %v2319_v50 = vpop.f32.mrf.mxu0 }
0x12df   : > { %2328 = vst.msk [vmem:[#allocation2] sm:$0xff] %vm788_vm1, %v2319_v50 }
0x12e7   : > { %v4614_v51 = vpop.f32.mrf.mxu0 }
0x12e9   : > { %v4616_v52 = vpop.f32.mrf.mxu0 }
0x12ef   : > { %v3912_v53 = vpop.f32.mrf.mxu0 }
0x12f0   : > { %v2636_v54 = vmul.f32 0.35355338, %v3912_v53 }
0x12f1   : > { %v2626_v55 = vpop.f32.mrf.mxu0 }
0x12f2   : > { %v2635_v56 = vmul.f32 0.35355338, %v2626_v55  ;;  %v2638_v58 = vadd.f32 %v4096_v57, %v2636_v54  ;;  %v3598_v55 = vld [vmem:[%s4780_s8 + $0x30] sm:$0xff] }
0x12f4   : > { %v2642_v59 = vsel %vm882_vm2, %v2638_v58, -inf  ;;  %v2637_v60 = vadd.f32 %v4096_v57, %v2635_v56  ;;  %v3597_v56 = vld [vmem:[%s4780_s8 + $0x28] sm:$0xff] }
0x12f5   : > { %2643 = vmax.xlane.f32.xlu1 %v2642_v59 }
0x12f6   : > { %v2639_v61 = vsel %vm882_vm2, %v2637_v60, -inf }
0x12f7   : > { %2640 = vmax.xlane.f32.xlu0 %v2639_v61 }
0x1306   : > { %2661 = vrot.lane.b32.xlu1 %v4546_v47, %s4828_s3 }
0x130a   : > { %2764 = vrot.lane.b32.xlu1 %v4544_v44, %s4829_s28 }
0x130e   : > { %2762 = vrot.lane.b32.xlu1 %v4546_v47, %s4829_s28  ;;  %s4834_s28 = smov 24  }
0x1312   : > { %2760 = vrot.lane.b32.xlu1 %v4544_v44, %s4830_s4 }
0x137e   : > { %v2644_v62 = vpop.xlane.xlu1 %2643 }
0x137f   : > { %v2646_v63 = vsub.f32 %v2638_v58, %v2644_v62 }
0x1380   : > { %v2641_v0 = vpop.xlane.xlu0 %2640 }
0x1381   : > { %v2649_v1 = vmul.f32 1.442695, %v2646_v63  ;;  %v2645_v2 = vsub.f32 %v2637_v60, %v2641_v0  ;;  %v3601_v0 = vld [vmem:[%s4781_s9 + $0x1] ss:$0 sm:$0xff] }
0x1382   : > { %v2662_v9 = vpop.permute.xlu1 %2661 }
0x1383   : > { %4064 = vpow2.f32 %v2649_v1  ;;  %v2647_v3 = vmul.f32 1.442695, %v2645_v2 }
0x1385   : > { %4066 = vpow2.f32 %v2647_v3 }
0x1386   : > { %v2765_v11 = vpop.permute.xlu1 %2764 }
0x138a   : > { %v2763_v15 = vpop.permute.xlu1 %2762 }
0x138e   : > { %v2761_v16 = vpop.permute.xlu1 %2760 }
0x1390   : > { %v4065_v4 = vpop.eup %4064 }
0x1391   : > { %v2654_v5 = vsel %vm882_vm2, %v4065_v4, 0.0 }
0x1392   : > { %v4067_v6 = vpop.eup %4066  ;;  %2655 = vadd.xlane.f32.xlu0 %v2654_v5 }
0x1393   : > { %v2651_v7 = vsel %vm882_vm2, %v4067_v6, 0.0 }
0x1396   : > { %2652 = vadd.xlane.f32.xlu0 %v2651_v7 }
0x13ac   : > { %2663 = vrot.lane.b32.xlu0 %v4544_v44, %s4828_s3  ;;  %s4835_s3 = sld [smem:[#allocation11_spill]] }
0x13b0   : > { %2758 = vrot.lane.b32.xlu0 %v4546_v47, %s4830_s4  ;;  %s3632_s4 = sshll.u32 %s4252_s19, 7 }
0x13b1   : > { %s3387_s24 = sadd.s32 2, %s3632_s4  ;;  %s3377_s2 = sld [smem:[#allocation5 + %s3632_s4]] }
0x13b2   : > { %s3392_s1 = sadd.s32 3, %s3632_s4  ;;  %s3388_s19 = sld [smem:[#allocation5 + %s3387_s24]] }
0x141b   : > { %v2656_v46 = vpop.xlane.xlu0 %2655 }
0x141c   : > { %4068 = vrcp.f32 %v2656_v46 }
0x141f   : > { %v2653_v8 = vpop.xlane.xlu0 %2652 }
0x1420   : > { %4070 = vrcp.f32 %v2653_v8 }
0x1423   : > { %v2664_v10 = vpop.permute.xlu0 %2663 }
0x1424   : > { %3913 = vmatprep.subr.mxu1 %v2664_v10 }
0x1425   : > { %3914 = vmatpush3.msra.mxu1 %v2664_v10 }
0x1426   : > { %3915 = vmatprep.subr.mxu1 %v2662_v9 }
0x1427   : > { %3916 = vmatpush3.msra.mxu1 %v2662_v9  ;;  %v2759_v14 = vpop.permute.xlu0 %2758 }
0x1428   : > { %3920 = vmatprep.subr.msk.mxu1 %vm788_vm1, %v2765_v11 }
0x1429   : > { %v4069_v12 = vpop.eup %4068 }
0x142a   : > { %v2660_v13 = vmul.f32 %v4069_v12, %v4065_v4 }
0x142d   : > { %v4071_v34 = vpop.eup %4070 }
0x142e   : > { %v2659_v32 = vmul.f32 %v4071_v34, %v4067_v6 }
0x1430   : > { %3917 = vmatprep.mubr.msk.f32.mxu1 %vm882_vm2, %v2659_v32 }
0x1431   : > { %3918 = vmatmul.mubr.msk.f32.vlgmr.msra.gmra.mxu1 %vm882_vm2, %v2660_v13 }
0x1432   : > { %3921 = vmatpush3.xpose.msk.msra.mxu1 %vm788_vm1, %v2765_v11  ;;  %3924 = vmatprep.mubr.msk.f32.mxu1 %vm788_vm1, %v2759_v14 }
0x1433   : > { %3922 = vmatprep.subr.msk.mxu1 %vm788_vm1, %v2763_v15 }
0x1436   : > { %3923 = vmatpush3.xpose.msk.msra.mxu1 %vm788_vm1, %v2763_v15  ;;  %v3610_v15 = vld [vmem:[%s4784_s12 + $0x30] sm:$0xff] }
0x1439   : > { %3925 = vmatmul.mubr.msk.f32.vlgmr.msra.gmra.mxu1 %vm788_vm1, %v2761_v16  ;;  %v3609_v16 = vld [vmem:[%s4784_s12 + $0x28] sm:$0xff] }
0x14f1   : > { %v3919_v17 = vpop.f32.mrf.mxu1 }
0x14f3   : > { %v2739_v18 = vpop.f32.mrf.mxu1 }
0x14f9   : > { %v3926_v19 = vpop.f32.mrf.mxu1 }
0x14fa   : > { %v2850_v20 = vmul.f32 0.35355338, %v3926_v19 }
0x14fb   : > { %v2840_v21 = vpop.f32.mrf.mxu1 }
0x14fc   : > { %v2849_v22 = vmul.f32 0.35355338, %v2840_v21  ;;  %v2852_v23 = vadd.f32 %v4096_v57, %v2850_v20 }
0x14fe   : > { %v2856_v24 = vsel %vm882_vm2, %v2852_v23, -inf  ;;  %v2851_v25 = vadd.f32 %v4096_v57, %v2849_v22  ;;  %v3596_v57 = vld [vmem:[%s4780_s8 + $0x20] sm:$0xff] }
0x14ff   : > { %2857 = vmax.xlane.f32.xlu1 %v2856_v24 }
0x1500   : > { %v2853_v26 = vsel %vm882_vm2, %v2851_v25, -inf }
0x1501   : > { %2854 = vmax.xlane.f32.xlu0 %v2853_v26 }
0x1510   : > { %2875 = vrot.lane.b32.xlu1 %v4546_v47, %s4831_s25 }
0x1514   : > { %2536 = vrot.lane.b32.xlu1 %v4616_v52, %s4832_s29 }
0x1518   : > { %2538 = vrot.lane.b32.xlu1 %v4614_v51, %s4832_s29  ;;  %s3389_s29 = scalar_lea.vmem [#allocation2], %s3388_s19 }
0x151c   : > { %2752 = vrot.lane.b32.xlu1 %v3919_v17, %s4833_s30  ;;  %v3608_v17 = vld [vmem:[%s4784_s12 + $0x20] sm:$0xff] }
0x1588   : > { %v2858_v27 = vpop.xlane.xlu1 %2857 }
0x1589   : > { %v2860_v28 = vsub.f32 %v2852_v23, %v2858_v27  ;;  %v3607_v27 = vld [vmem:[%s4783_s11 + $0x1] ss:$0 sm:$0xff] }
0x158a   : > { %v2855_v29 = vpop.xlane.xlu0 %2854 }
0x158b   : > { %v2863_v30 = vmul.f32 1.442695, %v2860_v28  ;;  %v2859_v39 = vsub.f32 %v2851_v25, %v2855_v29  ;;  %v3606_v25 = vld [vmem:[%s4782_s10 + $0x1] ss:$0 sm:$0xff] }
0x158c   : > { %v2876_v31 = vpop.permute.xlu1 %2875 }
0x158d   : > { %4072 = vpow2.f32 %v2863_v30  ;;  %v2861_v33 = vmul.f32 1.442695, %v2859_v39 }
0x158f   : > { %4074 = vpow2.f32 %v2861_v33 }
0x1590   : > { %v2537_v35 = vpop.permute.xlu1 %2536 }
0x1591   : > { %2542 = vst.msk [vmem:[#allocation2] sm:$0xff] %vm1206_vm3, %v2537_v35  ;;  %v3623_v35 = vld [vmem:[%s4786_s14 + $0x78] sm:$0xff] }
0x1594   : > { %v2539_v47 = vpop.permute.xlu1 %2538 }
0x1595   : > { %2543 = vst.msk [vmem:[#allocation2 + $0x8] sm:$0xff] %vm1206_vm3, %v2539_v47  ;;  %v3622_v47 = vld [vmem:[%s4786_s14 + $0x70] sm:$0xff] }
0x1598   : > { %v2753_v36 = vpop.permute.xlu1 %2752 }
0x1599   : > { %2757 = vst.msk [vmem:[#allocation2 + $0x8] sm:$0xff] %vm1421_vm4, %v2753_v36  ;;  %v3621_v36 = vld [vmem:[%s4786_s14 + $0x68] sm:$0xff] }
0x159a   : > { %v4073_v38 = vpop.eup %4072 }
0x159b   : > { %v2868_v42 = vsel %vm882_vm2, %v4073_v38, 0.0 }
0x159c   : > { %v4075_v43 = vpop.eup %4074  ;;  %2869 = vadd.xlane.f32.xlu0 %v2868_v42  ;;  %v3619_v42 = vld [vmem:[%s4786_s14 + $0x58] sm:$0xff] }
0x159d   : > { %v2865_v45 = vsel %vm882_vm2, %v4075_v43, 0.0 }
0x15a0   : > { %2866 = vadd.xlane.f32.xlu0 %v2865_v45  ;;  %v3617_v45 = vld [vmem:[%s4786_s14 + $0x48] sm:$0xff] }
0x15b6   : > { %2877 = vrot.lane.b32.xlu0 %v4544_v44, %s4831_s25  ;;  %v3599_v44 = vld [vmem:[%s4780_s8 + $0x38] sm:$0xff] }
0x15ba   : > { %2750 = vrot.lane.b32.xlu0 %v2739_v18, %s4833_s30  ;;  %s3382_s30 = sadd.s32 1, %s3632_s4 }
0x15bb   : > { %s3383_s22 = sld [smem:[#allocation5 + %s3382_s30]] }
0x15c1   : > { %s3384_s25 = scalar_lea.vmem [#allocation2], %s3383_s22 }
0x1625   : > { %v2870_v48 = vpop.xlane.xlu0 %2869 }
0x1626   : > { %4076 = vrcp.f32 %v2870_v48  ;;  %v3616_v48 = vld [vmem:[%s4786_s14 + $0x40] sm:$0xff] }
0x1629   : > { %v2867_v49 = vpop.xlane.xlu0 %2866 }
0x162a   : > { %4078 = vrcp.f32 %v2867_v49  ;;  %v3613_v49 = vld [vmem:[%s4824_s27 + $0x1] ss:$0 sm:$0xff] }
0x162d   : > { %v2878_v37 = vpop.permute.xlu0 %2877 }
0x162e   : > { %3927 = vmatprep.subr.mxu0 %v2878_v37 }
0x162f   : > { %3928 = vmatpush3.msra.mxu0 %v2878_v37 }
0x1630   : > { %3929 = vmatprep.subr.mxu0 %v2876_v31 }
0x1631   : > { %3930 = vmatpush3.msra.mxu0 %v2876_v31  ;;  %v2751_v50 = vpop.permute.xlu0 %2750 }
0x1632   : > { %2756 = vst.msk [vmem:[#allocation2] sm:$0xff] %vm1421_vm4, %v2751_v50  ;;  %3934 = vmatprep.subr.mxu0 %v3599_v44 }
0x1633   : > { %v4077_v51 = vpop.eup %4076 }
0x1634   : > { %v2874_v54 = vmul.f32 %v4077_v51, %v4073_v38  ;;  %v3620_v38 = vld [vmem:[%s4786_s14 + $0x60] sm:$0xff] }
0x1637   : > { %v4079_v52 = vpop.eup %4078 }
0x1638   : > { %v2873_v53 = vmul.f32 %v4079_v52, %v4075_v43  ;;  %v3618_v43 = vld [vmem:[%s4786_s14 + $0x50] sm:$0xff] }
0x163a   : > { %3931 = vmatprep.mubr.msk.f32.mxu0 %vm882_vm2, %v2873_v53 }
0x163b   : > { %3932 = vmatmul.mubr.msk.f32.vlgmr.msra.gmra.mxu0 %vm882_vm2, %v2874_v54 }
0x163c   : > { %3935 = vmatpush3.msra.mxu0 %v3599_v44 }
0x163d   : > { %3936 = vmatprep.subr.mxu0 %v3598_v55 }
0x163e   : > { %3937 = vmatpush3.msra.mxu0 %v3598_v55 }
0x163f   : > { %3938 = vmatprep.subr.mxu0 %v3597_v56 }
0x1640   : > { %3939 = vmatpush3.msra.mxu0 %v3597_v56 }
0x1641   : > { %3940 = vmatprep.subr.mxu0 %v3596_v57 }
0x1642   : > { %3941 = vmatpush3.msra.mxu0 %v3596_v57 }
0x1643   : > { %3956 = vmatprep.subr.mxu0 %v3623_v35 }
0x16fb   : > { %v3933_v58 = vpop.f32.mrf.mxu0 }
0x16fc   : > { %2966 = vrot.lane.b32.xlu1 %v3933_v58, %s4834_s28 }
0x16fd   : > { %v2953_v59 = vpop.f32.mrf.mxu0 }
0x16fe   : > { %2964 = vrot.lane.b32.xlu0 %v2953_v59, %s4834_s28  ;;  %s636_s28 = scalar_lea.vmem %s4835_s3, %s3519_s21  ;;  %s3393_s3 = sld [smem:[#allocation5 + %s3392_s1]] }
0x1704   : > { %s3394_s4 = scalar_lea.vmem [#allocation2], %s3393_s3 }
0x176e   : > { %v2967_v60 = vpop.permute.xlu1 %2966 }
0x176f   : > { %2971 = vst.msk [vmem:[#allocation2 + $0x8] sm:$0xff] %vm1636_vm5, %v2967_v60 }
0x1770   : > { %v2965_v61 = vpop.permute.xlu0 %2964 }
0x1771   : > { %2970 = vst.msk [vmem:[#allocation2] sm:$0xff] %vm1636_vm5, %v2965_v61 }
0x1776   : > { %v2973_v63 = vld [vmem:[#allocation2 + $0x8] sm:$0xff] }
0x1778   : > { %v2972_v62 = vld [vmem:[#allocation2] sm:$0xff] }
0x1779   : > { %3942 = vmatprep.mubr.msk.f32.mxu0 %vm645_vm0, %v2972_v62 }
0x177a   : > { %3943 = vmatmul.mubr.msk.f32.vlgmr.msra.gmra.mxu0 %vm645_vm0, %v2973_v63 }
0x177b   : > { %3957 = vmatpush3.msra.mxu0 %v3623_v35 }
0x177c   : > { %3958 = vmatprep.subr.mxu0 %v3622_v47 }
0x177d   : > { %3959 = vmatpush3.msra.mxu0 %v3622_v47 }
0x177e   : > { %3960 = vmatprep.subr.mxu0 %v3621_v36 }
0x177f   : > { %3961 = vmatpush3.msra.mxu0 %v3621_v36 }
0x1780   : > { %3962 = vmatprep.subr.mxu0 %v3620_v38 }
0x1781   : > { %3963 = vmatpush3.msra.mxu0 %v3620_v38 }
0x1782   : > { %3964 = vmatprep.subr.mxu0 %v3619_v42 }
0x1783   : > { %3965 = vmatpush3.msra.mxu0 %v3619_v42 }
0x1784   : > { %3966 = vmatprep.subr.mxu0 %v3618_v43 }
0x1785   : > { %3967 = vmatpush3.msra.mxu0 %v3618_v43 }
0x1786   : > { %3968 = vmatprep.subr.mxu0 %v3617_v45 }
0x1787   : > { %3969 = vmatpush3.msra.mxu0 %v3617_v45 }
0x1788   : > { %3970 = vmatprep.subr.mxu0 %v3616_v48 }
0x1789   : > { %3971 = vmatpush3.msra.mxu0 %v3616_v48 }
0x183a   : > { %v3944_v1 = vpop.f32.mrf.mxu0 }
0x183b   : > { %v3065_v2 = vadd.f32 %v3944_v1, %v3601_v0 }
0x183c   : > { %v3059_v3 = vpop.f32.mrf.mxu0 }
0x183d   : > { %v3069_v4 = vadd.f32 %v3065_v2, %v4535_v41  ;;  %v3060_v5 = vadd.f32 %v3601_v0, %v3059_v3 }
0x183f   : > { %v3068_v6 = vadd.f32 %v3060_v5, %v4533_v40  ;;  %v3077_v7 = vsel %vm645_vm0, %v3069_v4, 0.0  ;;  %v3611_v40 = vld [vmem:[%s4784_s12 + $0x38] sm:$0xff] }
0x1840   : > { %3078 = vadd.xlane.f32.xlu1 %v3077_v7  ;;  %3945 = vmatprep.subr.mxu1 %v3611_v40 }
0x1841   : > { %v3074_v46 = vsel %vm645_vm0, %v3068_v6, 0.0  ;;  %3946 = vmatpush3.msra.mxu1 %v3611_v40 }
0x1842   : > { %3075 = vadd.xlane.f32.xlu0 %v3074_v46  ;;  %3947 = vmatprep.subr.mxu1 %v3610_v15 }
0x1843   : > { %3948 = vmatpush3.msra.mxu1 %v3610_v15 }
0x1844   : > { %3949 = vmatprep.subr.mxu1 %v3609_v16 }
0x1845   : > { %3950 = vmatpush3.msra.mxu1 %v3609_v16 }
0x1846   : > { %3951 = vmatprep.subr.mxu1 %v3608_v17 }
0x1847   : > { %3952 = vmatpush3.msra.mxu1 %v3608_v17 }
0x18c9   : > { %v3079_v8 = vpop.xlane.xlu1 %3078 }
0x18ca   : > { %v3081_v9 = vmul.f32 0.03125, %v3079_v8 }
0x18cb   : > { %v3076_v10 = vpop.xlane.xlu0 %3075 }
0x18cc   : > { %v3080_v11 = vmul.f32 0.03125, %v3076_v10  ;;  %v3083_v12 = vsub.f32 %v3069_v4, %v3081_v9 }
0x18ce   : > { %v3082_v34 = vsub.f32 %v3068_v6, %v3080_v11  ;;  %v3085_v14 = vmul.f32 %v3083_v12, %v3083_v12  ;;  %v3625_v6 = vld [vmem:[%s4787_s15 + $0x1] ss:$0 sm:$0xff] }
0x18d0   : > { %v3084_v32 = vmul.f32 %v3082_v34, %v3082_v34  ;;  %v3089_v41 = vsel %vm645_vm0, %v3085_v14, 0.0 }
0x18d2   : > { %v3086_v13 = vsel %vm645_vm0, %v3084_v32, 0.0  ;;  %v4134_v32 = vmov 0  }
0x18d3   : > { %3087 = vadd.xlane.f32.xlu0 %v3086_v13 }
0x18d4   : > { %3999 = vset.pattern.permute.xlu0 %v4134_v32 }
0x18d7   : > { %3090 = vadd.xlane.f32.xlu0 %v3089_v41 }
0x195c   : > { %v3088_v18 = vpop.xlane.xlu0 %3087 }
0x195d   : > { %v3092_v19 = vmul.f32 0.03125, %v3088_v18 }
0x195f   : > { %v3094_v20 = vadd.f32 1e-05, %v3092_v19 }
0x1960   : > { %v3091_v21 = vpop.xlane.xlu0 %3090 }
0x1961   : > { %4080 = vrsqrt.f32 %v3094_v20  ;;  %v3093_v22 = vmul.f32 0.03125, %v3091_v21  ;;  %v3397_v21 = vld [vmem:[%s636_s28] sm:$0xf]  ;;  %s3378_s28 = scalar_lea.vmem [#allocation2], %s3377_s2  ;;  %s640_s2 = scalar_lea.vmem %s4791_s20, %s3519_s21 }
0x1963   : > { %v3095_v23 = vadd.f32 1e-05, %v3093_v22 }
0x1965   : > { %4082 = vrsqrt.f32 %v3095_v23 }
0x196e   : > { %v4081_v24 = vpop.eup %4080 }
0x196f   : > { %v3098_v26 = vmul.f32 %v4081_v24, %v3082_v34 }
0x1971   : > { %v3106_v28 = vmul.f32 %v3606_v25, %v3098_v26 }
0x1972   : > { %v4083_v29 = vpop.eup %4082 }
0x1973   : > { %v3099_v30 = vmul.f32 %v4083_v29, %v3083_v12  ;;  %v3114_v39 = vadd.f32 %v3607_v27, %v3106_v28  ;;  %v3630_v29 = vld [vmem:[%s4788_s16 + $0x1] ss:$0 sm:$0xff] }
0x1975   : > { %v3107_v31 = vmul.f32 %v3606_v25, %v3099_v30  ;;  %3953 = vmatprep.mubr.msk.f32.mxu1 %vm645_vm0, %v3114_v39 }
0x1977   : > { %v3115_v33 = vadd.f32 %v3607_v27, %v3107_v31  ;;  %v3631_v31 = vld [vmem:[%s4789_s17 + $0x1] ss:$0 sm:$0xff] }
0x1979   : > { %3954 = vmatmul.mubr.msk.f32.vlgmr.msra.gmra.mxu1 %vm645_vm0, %v3115_v33 }
0x1a39   : > { %v3955_v37 = vpop.f32.mrf.mxu1 }
0x1a3a   : > { %v3207_v50 = vadd.f32 %v3955_v37, %v3613_v49 }
0x1a3b   : > { %v3201_v51 = vpop.f32.mrf.mxu1 }
0x1a3c   : > { %v3211_v52 = vmul.f32 %v3207_v50, %v3207_v50  ;;  %v3202_v53 = vadd.f32 %v3613_v49, %v3201_v51 }
0x1a3e   : > { %v3213_v54 = vmul.f32 %v3211_v52, %v3207_v50  ;;  %v3210_v44 = vmul.f32 %v3202_v53, %v3202_v53 }
0x1a40   : > { %v3215_v55 = vmul.f32 0.044715, %v3213_v54  ;;  %v3212_v56 = vmul.f32 %v3210_v44, %v3202_v53  ;;  %v3634_v54 = vld [vmem:[#allocation6] ss:$0 sm:$0xff] }
0x1a42   : > { %v3217_v57 = vadd.f32 %v3215_v55, %v3207_v50  ;;  %v3214_v58 = vmul.f32 0.044715, %v3212_v56 }
0x1a44   : > { %v3219_v59 = vmul.f32 0.7978846, %v3217_v57  ;;  %v3216_v60 = vadd.f32 %v3214_v58, %v3202_v53 }
0x1a46   : > { %4084 = vtanh.f32 %v3219_v59  ;;  %v3218_v61 = vmul.f32 0.7978846, %v3216_v60 }
0x1a48   : > { %4086 = vtanh.f32 %v3218_v61 }
0x1a53   : > { %v4085_v62 = vpop.eup %4084 }
0x1a54   : > { %v3223_v63 = vadd.f32 1.0, %v4085_v62 }
0x1a55   : > { %v4087_v0 = vpop.eup %4086 }
0x1a56   : > { %v3222_v1 = vadd.f32 1.0, %v4087_v0  ;;  %v3225_v2 = vmul.f32 0.5, %v3223_v63 }
0x1a58   : > { %v3224_v3 = vmul.f32 0.5, %v3222_v1  ;;  %v3227_v5 = vmul.f32 %v3225_v2, %v3207_v50  ;;  %v3633_v50 = vld [vmem:[%s4790_s18] ss:$0 sm:$0xff] }
0x1a5a   : > { %v3226_v4 = vmul.f32 %v3224_v3, %v3202_v53 }
0x1a5c   : > { %3972 = vmatprep.mubr.msk.f32.mxu0 %vm1904_vm6, %v3226_v4 }
0x1a5d   : > { %3973 = vmatmul.mubr.msk.f32.vlgmr.msra.gmra.mxu0 %vm1904_vm6, %v3227_v5 }
0x1b1d   : > { %v3974_v7 = vpop.f32.mrf.mxu0 }
0x1b1e   : > { %v3323_v46 = vadd.f32 %v3974_v7, %v3625_v6 }
0x1b1f   : > { %v3317_v8 = vpop.f32.mrf.mxu0 }
0x1b20   : > { %v3327_v9 = vadd.f32 %v3323_v46, %v3115_v33  ;;  %v3318_v10 = vadd.f32 %v3625_v6, %v3317_v8 }
0x1b22   : > { %v3326_v11 = vadd.f32 %v3318_v10, %v3114_v39  ;;  %v3335_v12 = vsel %vm645_vm0, %v3327_v9, 0.0 }
0x1b23   : > { %3336 = vadd.xlane.f32.xlu1 %v3335_v12 }
0x1b24   : > { %v3332_v34 = vsel %vm645_vm0, %v3326_v11, 0.0 }
0x1b25   : > { %3333 = vadd.xlane.f32.xlu0 %v3332_v34 }
0x1bac   : > { %v3337_v13 = vpop.xlane.xlu1 %3336 }
0x1bad   : > { %v3339_v14 = vmul.f32 0.03125, %v3337_v13 }
0x1bae   : > { %v3334_v41 = vpop.xlane.xlu0 %3333 }
0x1baf   : > { %v3341_v40 = vsub.f32 %v3327_v9, %v3339_v14  ;;  %v3338_v15 = vmul.f32 0.03125, %v3334_v41 }
0x1bb1   : > { %v3340_v16 = vsub.f32 %v3326_v11, %v3338_v15  ;;  %v3343_v17 = vmul.f32 %v3341_v40, %v3341_v40 }
0x1bb3   : > { %v3347_v18 = vsel %vm645_vm0, %v3343_v17, 0.0  ;;  %v3342_v19 = vmul.f32 %v3340_v16, %v3340_v16 }
0x1bb4   : > { %3348 = vadd.xlane.f32.xlu1 %v3347_v18 }
0x1bb5   : > { %v3344_v20 = vsel %vm645_vm0, %v3342_v19, 0.0 }
0x1bb6   : > { %3345 = vadd.xlane.f32.xlu0 %v3344_v20 }
0x1bcc   : > { %3401 = vperm.xlu0 %3999, %v3397_v21  }
0x1c3d   : > { %v3349_v22 = vpop.xlane.xlu1 %3348 }
0x1c3e   : > { %v3351_v23 = vmul.f32 0.03125, %v3349_v22 }
0x1c3f   : > { %v3346_v24 = vpop.xlane.xlu0 %3345 }
0x1c40   : > { %v3353_v25 = vadd.f32 1e-05, %v3351_v23  ;;  %v3350_v26 = vmul.f32 0.03125, %v3346_v24 }
0x1c42   : > { %4088 = vrsqrt.f32 %v3353_v25  ;;  %v3352_v27 = vadd.f32 1e-05, %v3350_v26 }
0x1c44   : > { %4090 = vrsqrt.f32 %v3352_v27 }
0x1c47   : > { %v3402_v49 = vpop.permute.xlu0 %3401 }
0x1c4f   : > { %v4089_v28 = vpop.eup %4088 }
0x1c50   : > { %v3357_v30 = vmul.f32 %v4089_v28, %v3341_v40 }
0x1c51   : > { %v4091_v39 = vpop.eup %4090 }
0x1c52   : > { %v3365_v33 = vmul.f32 %v3630_v29, %v3357_v30  ;;  %v3356_v35 = vmul.f32 %v4091_v39, %v3340_v16 }
0x1c54   : > { %v3373_v47 = vadd.f32 %v3631_v31, %v3365_v33  ;;  %v3364_v36 = vmul.f32 %v3630_v29, %v3356_v35 }
0x1c56   : > { %3375 = vst.msk [vmem:[#allocation2 + $0x8] sm:$0xff] %vm645_vm0, %v3373_v47  ;;  %v3372_v38 = vadd.f32 %v3631_v31, %v3364_v36 }
0x1c58   : > { %3374 = vst.msk [vmem:[#allocation2] sm:$0xff] %vm645_vm0, %v3372_v38 }
0x1c5f   : > { %v3379_v42 = vld [vmem:[%s3378_s28] sm:$0x1] }
0x1c60   : > { %v3385_v43 = vld [vmem:[%s3384_s25] sm:$0x1]  ;;  %3381 = vst.msk [vmem:[#allocation3] sm:$0x1] %vm3380_vm7, %v3379_v42 }
0x1c61   : > { %v3390_v45 = vld [vmem:[%s3389_s29] sm:$0x1]  ;;  %3386 = vst.msk [vmem:[#allocation3 + $0x1] sm:$0x1] %vm3380_vm7, %v3385_v43 }
0x1c62   : > { %3391 = vst.msk [vmem:[#allocation3 + $0x2] sm:$0x1] %vm3380_vm7, %v3390_v45  ;;  %v3395_v48 = vld [vmem:[%s3394_s4] sm:$0x1] }
0x1c63   : > { %3396 = vst.msk [vmem:[#allocation3 + $0x3] sm:$0x1] %vm3380_vm7, %v3395_v48 }
0x1c6a   : > { %v3398_v37 = vld [vmem:[#allocation3] sm:$0xf] }
0x1c6b   : > { %v3404_v51 = vmul.f32 %v3402_v49, %v3398_v37 }
0x1c6d   : > { %v3412_v52 = vmul.f32 %v3633_v50, %v3404_v51 }
0x1c6f   : > { %v3414_v53 = vsel %vm3413_vm8, %v3412_v52, 0.0 }
0x1c70   : > { %3415 = vadd.xlane.f32.xlu1 %v3414_v53 }
0x1cf9   : > { %v3416_v44 = vpop.xlane.xlu1 %3415 }
0x1cfa   : > { %v3424_v55 = vadd.f32 %v3634_v54, %v3416_v44 }
0x1cfc   : > { %v3635_v56 = vmul.f32 -1.442695, %v3424_v55 }
0x1cfe   : > { %4092 = vpow2.f32 %v3635_v56 }
0x1d0b   : > { %v4093_v57 = vpop.eup %4092 }
0x1d0c   : > { %v3428_v58 = vadd.f32 1.0, %v4093_v57 }
0x1d0e   : > { %4094 = vrcp.f32 %v3428_v58 }
0x1d1b   : > { %v4095_v59 = vpop.eup %4094 }
0x1d1c   : > { %v3431_v60 = vmul.f32 %v4095_v59, %v3397_v21 }
0x1d1e   : > { %3433 = vst.msk [vmem:[%s640_s2] sm:$0xf] %vm3432_vm9, %v3431_v60 }
0x1d1f PF: > { %s38_s26 = sadd.s32 1, %s4117_s26  }
0x1d20   : > { %p35_p9 = scmp.ge.s32.totalorder %s38_s26, 4  }
0x1d22   :  { %37 = sbr.rel (!%p35_p9) target bundleno = 28 (0x1c), region = 148 }

</bundles_post_ra>
